<compile_context>
chip_gen: v5e
topology: v5e:2x2
jax: 0.10.0
libtpu: 0.0.40
codegen_flags: <defaults>
</compile_context>

<pallas_src>
import functools

import numpy as np

import jax
import jax.numpy as jnp
from jax import lax
from jax.experimental import pallas as pl
from jax.experimental.pallas import tpu as pltpu


def _vmem_budget():
    """Return (per-step working-set budget, scoped vmem limit), per generation."""
    try:
        cap = int(pltpu.get_tpu_info().vmem_capacity_bytes)  # 128 MiB v5e/v6e, 64 MiB v7x
    except Exception:
        cap = 64 * 1024 * 1024                               # conservative (v7x per-core)
    return cap // 4, cap // 2


def _pick_tile_h(H, W, C, pad, budget, max_rows=None):
    """Largest row tile th dividing H with th%8==0 (or th==H) fitting the budget."""
    wpxc = (W + 2 * pad + 2) * C
    wc = W * C

    def cost(t):
        # halo window + double-buffered act block + ~4 shift-FMA temporaries (f32)
        return 4 * ((t + 2 * pad) * wpxc + 6 * t * wc)

    cands = [t for t in range(1, H + 1) if H % t == 0 and (t % 8 == 0 or t == H)]
    ok = [t for t in cands
          if cost(t) <= budget and (max_rows is None or t <= max_rows)]
    # TODO(synk): fallback may exceed the budget when H has no divisor that is a
    #             multiple of 8; correctness is preserved, re-check VMEM on v7x.
    return max(ok) if ok else min(cands)


def _pick_tile_rows(R, wc, budget):
    """Largest row tile for the lane-dense BN-apply pass (double-buffered in+out)."""
    cands = [t for t in range(1, R + 1) if R % t == 0 and (t % 8 == 0 or t == R)]
    ok = [t for t in cands if 4 * (4 * t * wc) <= budget]
    return max(ok) if ok else min(cands)


def _pack_shift_weights(conv_w_oihw, W, C, K):
    """(K, (K+1)*C-1, W*C) lane-dense weight vectors for the shifted-FMA conv.

    Output lane l = w*C + c at shift t (source slab lane l + t) gets weight
    conv_w[c, ci, dy, dx] where (dx+1)*C + ci == t + c, or 0 if no such tap.
    """
    nT = (K + 1) * C - 1
    t = np.arange(1, nT + 1)[:, None]                 # (nT, 1)
    c = np.arange(C)[None, :]                         # (1, C)
    q = t + c                                         # (nT, C)
    d1 = q // C                                       # dx + 1
    ci = q % C
    valid = ((d1 >= 1) & (d1 <= K)).astype(np.float32)
    dx = np.clip(d1 - 1, 0, K - 1)
    co = np.broadcast_to(c, (nT, C))
    w = conv_w_oihw.astype(jnp.float32)
    # Advanced-index dims first, the remaining dy axis last -> (nT, C, K).
    gathered = w[co, ci, :, dx] * valid[:, :, None]
    wvc = jnp.transpose(gathered, (2, 0, 1))          # (K, nT, C)
    return jnp.tile(wvc, (1, 1, W))                   # (K, nT, W*C); lane w*C+c -> [.., c]


def _conv_relu_stats_kernel(x_hbm, wv_ref, b_ref, act_ref, stat_ref, xwin, sem,
                            *, th, pad, W, C, K, Hp):
    """Pass A: halo-window DMA + lane-dense 3x3 conv + bias + ReLU + tile stats.

    x_hbm:    (N*Hp, Wpx*C) f32 padded NHWC slab in HBM (manual DMA)
    wv_ref:   (K, nT, W*C)  f32 per-shift weight vectors (resident)
    b_ref:    (1, W*C)      f32 bias tiled over w
    act_ref:  (1, th, W*C)  f32 conv+bias+ReLU output tile
    stat_ref: (1, 1, 2, W*C) f32 per-tile [sum; sum of squares]
    xwin:     VMEM (th+2*pad, Wpx*C) scratch, sem: DMA semaphore
    """
    n = pl.program_id(0)
    i = pl.program_id(1)
    wc = W * C
    nT = (K + 1) * C - 1

    # Halo window: padded rows [n*Hp + i*th, n*Hp + i*th + th + 2*pad).
    row0 = n * Hp + i * th
    cp = pltpu.make_async_copy(x_hbm.at[pl.ds(row0, th + 2 * pad)], xwin, sem.at[0])
    cp.start()
    cp.wait()

    wv = wv_ref[...]                                  # (K, nT, W*C)
    acc = jnp.zeros((th, wc), jnp.float32)
    for dy in range(K):                               # unrolled K*nT shift-FMAs (VPU)
        for ti in range(nT):
            acc = acc + (xwin[dy:dy + th, ti + 1:ti + 1 + wc]
                         * wv[dy, ti:ti + 1, :])
    acc = acc + b_ref[...]                            # (1, W*C) broadcast
    acc = jnp.maximum(acc, 0.0)                       # ReLU
    act_ref[0] = acc

    ssum = jnp.sum(acc, axis=0, keepdims=True)        # (1, W*C)
    ssq = jnp.sum(acc * acc, axis=0, keepdims=True)   # (1, W*C)
    stat_ref[0, 0] = jnp.concatenate([ssum, ssq], axis=0)


def _bn_apply_kernel(a_ref, scale_ref, shift_ref, o_ref):
    """Pass B: lane-dense per-channel affine y = a*scale + shift."""
    o_ref[...] = a_ref[...] * scale_ref[...] + shift_ref[...]


def conv_bridge_block(x_nchw, conv_w_oihw, conv_b, bn_gamma, bn_beta,
                      *, k_sz=3, eps=1e-5, max_tile_rows=None):
    """Forward pass of ConvBridgeBlock.

    x_nchw:      (N, C, H, W) float32
    conv_w_oihw: (C, C, K, K) float32 (PyTorch OIHW)
    conv_b, bn_gamma, bn_beta: (C,) float32
    returns (N, C, H, W) float32
    """
    N, C, H, W = x_nchw.shape
    K = k_sz
    pad = (K - 1) // 2
    Hp = H + 2 * pad
    Wpx = W + 2 * (pad + 1)      # one extra zero column per side keeps lane shifts >= 0
    wc = W * C
    nT = (K + 1) * C - 1

    budget, vmem_limit = _vmem_budget()
    th = _pick_tile_h(H, W, C, pad, budget, max_tile_rows)
    nH = H // th

    # ---- wrapper glue: layout + zero padding + parameter packing ----
    x_nhwc = jnp.transpose(x_nchw.astype(jnp.float32), (0, 2, 3, 1))
    x_pad = jnp.pad(x_nhwc, ((0, 0), (pad, pad), (pad + 1, pad + 1), (0, 0)))
    x_flat = x_pad.reshape(N * Hp, Wpx * C)           # free reshape; rows = n*Hp + r

    wv = _pack_shift_weights(conv_w_oihw, W, C, K)
    bvec = jnp.tile(conv_b.astype(jnp.float32), W).reshape(1, wc)

    kernel_a = functools.partial(_conv_relu_stats_kernel,
                                 th=th, pad=pad, W=W, C=C, K=K, Hp=Hp)

    # ---- pass A: conv + bias + ReLU + per-tile stats, grid over (image, row tile) ----
    act, stats = pl.pallas_call(
        kernel_a,
        out_shape=(
            jax.ShapeDtypeStruct((N, H, wc), jnp.float32),
            jax.ShapeDtypeStruct((N, nH, 2, wc), jnp.float32),
        ),
        grid=(N, nH),
        in_specs=[
            pl.BlockSpec(memory_space=pl.ANY),                      # padded slab (manual DMA)
            pl.BlockSpec((K, nT, wc), lambda n, i: (0, 0, 0)),      # shift weights (resident)
            pl.BlockSpec((1, wc), lambda n, i: (0, 0)),             # bias
        ],
        out_specs=(
            pl.BlockSpec((1, th, wc), lambda n, i: (n, i, 0)),
            pl.BlockSpec((1, 1, 2, wc), lambda n, i: (n, i, 0, 0)),
        ),
        scratch_shapes=[
            pltpu.VMEM((th + 2 * pad, Wpx * C), jnp.float32),
            pltpu.SemaphoreType.DMA((1,)),
        ],
        compiler_params=pltpu.CompilerParams(
            dimension_semantics=("parallel", "parallel"),
            vmem_limit_bytes=vmem_limit),
    )(x_flat, wv, bvec)

    # ---- O(C) cross-tile stat combine + BN constant folding (biased variance) ----
    cnt = jnp.float32(N * H * W)
    s = jnp.sum(stats, axis=(0, 1)).reshape(2, W, C).sum(axis=1)    # (2, C)
    mean = s[0] / cnt
    var = jnp.maximum(s[1] / cnt - mean * mean, 0.0)
    scale = bn_gamma.astype(jnp.float32) * lax.rsqrt(var + eps)
    shift = bn_beta.astype(jnp.float32) - mean * scale
    scale_t = jnp.tile(scale, W).reshape(1, wc)
    shift_t = jnp.tile(shift, W).reshape(1, wc)

    # ---- pass B: lane-dense normalize over big (rows, W*C) tiles, in place ----
    R = N * H
    tr = _pick_tile_rows(R, wc, budget)
    out2 = pl.pallas_call(
        _bn_apply_kernel,
        out_shape=jax.ShapeDtypeStruct((R, wc), jnp.float32),
        grid=(R // tr,),
        in_specs=[
            pl.BlockSpec((tr, wc), lambda r: (r, 0)),
            pl.BlockSpec((1, wc), lambda r: (0, 0)),
            pl.BlockSpec((1, wc), lambda r: (0, 0)),
        ],
        out_specs=pl.BlockSpec((tr, wc), lambda r: (r, 0)),
        input_output_aliases={0: 0},
        compiler_params=pltpu.CompilerParams(
            dimension_semantics=("parallel",),
            vmem_limit_bytes=vmem_limit),
    )(act.reshape(R, wc), scale_t, shift_t)            # free HBM reshape

    return jnp.transpose(out2.reshape(N, H, W, C), (0, 3, 1, 2))


def _reference(x_nchw, conv_w_oihw, conv_b, bn_gamma, bn_beta, eps=1e-5):
    """Pure-JAX f32 reference matching torch semantics (training-mode BN)."""
    y = lax.conv_general_dilated(
        x_nchw, conv_w_oihw, window_strides=(1, 1), padding="SAME",
        dimension_numbers=("NCHW", "OIHW", "NCHW"))
    y = y + conv_b.reshape(1, -1, 1, 1)
    y = jnp.maximum(y, 0.0)
    mean = jnp.mean(y, axis=(0, 2, 3), keepdims=True)
    var = jnp.mean(jnp.square(y - mean), axis=(0, 2, 3), keepdims=True)
    y = (y - mean) * lax.rsqrt(var + eps)
    return y * bn_gamma.reshape(1, -1, 1, 1) + bn_beta.reshape(1, -1, 1, 1)


if __name__ == "__main__":
    # Small shapes consistent with the module: batch=2, channels=4, 16x16 spatial.
    N, C, H, W, K = 2, 4, 16, 16, 3
    key = jax.random.PRNGKey(0)
    k_x, k_w, k_b, k_g, k_bt = jax.random.split(key, 5)

    x = jax.random.normal(k_x, (N, C, H, W), jnp.float32)
    conv_w = jax.random.normal(k_w, (C, C, K, K), jnp.float32) * 0.1
    conv_b = jax.random.normal(k_b, (C,), jnp.float32) * 0.1
    bn_gamma = 1.0 + 0.1 * jax.random.normal(k_g, (C,), jnp.float32)
    bn_beta = 0.1 * jax.random.normal(k_bt, (C,), jnp.float32)

    ref = _reference(x, conv_w, conv_b, bn_gamma, bn_beta)

    # Default tiling (whole H per tile) plus a forced 8-row tiling that exercises
    # the halo-window DMA across multiple row tiles.
    for rows in (None, 8):
        out = conv_bridge_block(x, conv_w, conv_b, bn_gamma, bn_beta,
                                k_sz=K, max_tile_rows=rows)
        out = jax.block_until_ready(out)
        assert out.shape == (N, C, H, W)
        err = jnp.max(jnp.abs(out - ref))
        assert jnp.allclose(out, ref, atol=1e-3, rtol=1e-3), (
            f"max abs err {err} (tile_rows={rows})")
    print("KERNEL_OK")
</pallas_src>

<mosaic_0001>
module attributes {stable_mosaic.version = 11 : i64} {
  func.func @_conv_relu_stats_kernel(%arg0: i32, %arg1: i32, %arg2: memref<36x80xf32, #tpu.memory_space<any>>, %arg3: memref<3x15x64xf32, #tpu.memory_space<vmem>>, %arg4: memref<1x64xf32, #tpu.memory_space<vmem>>, %arg5: memref<1x16x64xf32, #tpu.memory_space<vmem>>, %arg6: memref<1x1x2x64xf32, #tpu.memory_space<vmem>>, %arg7: memref<18x80xf32, #tpu.memory_space<vmem>>, %arg8: memref<1x!tpu.dma_semaphore, #tpu.memory_space<semaphore_mem>>) attributes {dimension_semantics = [#tpu.dimension_semantics<parallel>, #tpu.dimension_semantics<parallel>], iteration_bounds = array<i64: 2, 1>, scalar_prefetch = 0 : i64, scratch_operands = 2 : i64, tpu.core_type = #tpu.core_type<tc>, window_params = [{}, {pipeline_mode = #tpu.pipeline_mode<synchronous>, transform_indices = @transform_1, window_bounds = array<i64: 3, 15, 64>}, {pipeline_mode = #tpu.pipeline_mode<synchronous>, transform_indices = @transform_2, window_bounds = array<i64: 1, 64>}, {transform_indices = @transform_3, window_bounds = array<i64: 1, 16, 64>}, {transform_indices = @transform_4, window_bounds = array<i64: 1, 1, 2, 64>}]} {
    %c18_i32 = arith.constant 18 : i32
    %0 = arith.muli %arg0, %c18_i32 : i32
    %c16_i32 = arith.constant 16 : i32
    %1 = arith.muli %arg1, %c16_i32 : i32
    %2 = arith.addi %0, %1 : i32
    %c0_i32 = arith.constant 0 : i32
    %c0_i32_0 = arith.constant 0 : i32
    %3 = tpu.memref_slice %arg2[%2, %c0_i32_0] : memref<36x80xf32, #tpu.memory_space<any>> -> memref<18x80xf32, #tpu.memory_space<any>>
    %4 = tpu.memref_slice %arg8[%c0_i32] : memref<1x!tpu.dma_semaphore, #tpu.memory_space<semaphore_mem>> -> memref<1x!tpu.dma_semaphore, #tpu.memory_space<semaphore_mem>>
    %5 = tpu.memref_squeeze %4 : memref<1x!tpu.dma_semaphore, #tpu.memory_space<semaphore_mem>> -> memref<!tpu.dma_semaphore, #tpu.memory_space<semaphore_mem>>
    tpu.enqueue_dma source(%3 : memref<18x80xf32, #tpu.memory_space<any>>) target(%arg7 : memref<18x80xf32, #tpu.memory_space<vmem>>) target_semaphore(%5 : memref<!tpu.dma_semaphore, #tpu.memory_space<semaphore_mem>>)
    %c0_i32_1 = arith.constant 0 : i32
    %c0_i32_2 = arith.constant 0 : i32
    %6 = tpu.memref_slice %arg2[%2, %c0_i32_2] : memref<36x80xf32, #tpu.memory_space<any>> -> memref<18x80xf32, #tpu.memory_space<any>>
    %7 = tpu.memref_slice %arg8[%c0_i32_1] : memref<1x!tpu.dma_semaphore, #tpu.memory_space<semaphore_mem>> -> memref<1x!tpu.dma_semaphore, #tpu.memory_space<semaphore_mem>>
    %8 = tpu.memref_squeeze %7 : memref<1x!tpu.dma_semaphore, #tpu.memory_space<semaphore_mem>> -> memref<!tpu.dma_semaphore, #tpu.memory_space<semaphore_mem>>
    tpu.wait_dma2 semaphore(%8 : memref<!tpu.dma_semaphore, #tpu.memory_space<semaphore_mem>>) src(%6 : memref<18x80xf32, #tpu.memory_space<any>>) dst(%arg7 : memref<18x80xf32, #tpu.memory_space<vmem>>)
    %c0 = arith.constant 0 : index
    %c0_3 = arith.constant 0 : index
    %c0_4 = arith.constant 0 : index
    %9 = vector.load %arg3[%c0, %c0_3, %c0_4] : memref<3x15x64xf32, #tpu.memory_space<vmem>>, vector<3x15x64xf32>
    %cst = arith.constant 0.000000e+00 : f32
    %10 = vector.broadcast %cst : f32 to vector<16x64xf32>
    %c0_5 = arith.constant 0 : index
    %c1 = arith.constant 1 : index
    %11 = vector.load %arg7[%c0_5, %c1] : memref<18x80xf32, #tpu.memory_space<vmem>>, vector<16x64xf32>
    %12 = vector.extract_strided_slice %9 {offsets = [0, 0, 0], sizes = [1, 1, 64], strides = [1, 1, 1]} : vector<3x15x64xf32> to vector<1x1x64xf32>
    %13 = vector.shape_cast %12 : vector<1x1x64xf32> to vector<1x64xf32>
    %14 = vector.broadcast %13 : vector<1x64xf32> to vector<16x64xf32>
    %15 = arith.mulf %11, %14 : vector<16x64xf32>
    %16 = arith.addf %10, %15 : vector<16x64xf32>
    %c0_6 = arith.constant 0 : index
    %c2 = arith.constant 2 : index
    %17 = vector.load %arg7[%c0_6, %c2] : memref<18x80xf32, #tpu.memory_space<vmem>>, vector<16x64xf32>
    %18 = vector.extract_strided_slice %9 {offsets = [0, 1, 0], sizes = [1, 1, 64], strides = [1, 1, 1]} : vector<3x15x64xf32> to vector<1x1x64xf32>
    %19 = vector.shape_cast %18 : vector<1x1x64xf32> to vector<1x64xf32>
    %20 = vector.broadcast %19 : vector<1x64xf32> to vector<16x64xf32>
    %21 = arith.mulf %17, %20 : vector<16x64xf32>
    %22 = arith.addf %16, %21 : vector<16x64xf32>
    %c0_7 = arith.constant 0 : index
    %c3 = arith.constant 3 : index
    %23 = vector.load %arg7[%c0_7, %c3] : memref<18x80xf32, #tpu.memory_space<vmem>>, vector<16x64xf32>
    %24 = vector.extract_strided_slice %9 {offsets = [0, 2, 0], sizes = [1, 1, 64], strides = [1, 1, 1]} : vector<3x15x64xf32> to vector<1x1x64xf32>
    %25 = vector.shape_cast %24 : vector<1x1x64xf32> to vector<1x64xf32>
    %26 = vector.broadcast %25 : vector<1x64xf32> to vector<16x64xf32>
    %27 = arith.mulf %23, %26 : vector<16x64xf32>
    %28 = arith.addf %22, %27 : vector<16x64xf32>
    %c0_8 = arith.constant 0 : index
    %c4 = arith.constant 4 : index
    %29 = vector.load %arg7[%c0_8, %c4] : memref<18x80xf32, #tpu.memory_space<vmem>>, vector<16x64xf32>
    %30 = vector.extract_strided_slice %9 {offsets = [0, 3, 0], sizes = [1, 1, 64], strides = [1, 1, 1]} : vector<3x15x64xf32> to vector<1x1x64xf32>
    %31 = vector.shape_cast %30 : vector<1x1x64xf32> to vector<1x64xf32>
    %32 = vector.broadcast %31 : vector<1x64xf32> to vector<16x64xf32>
    %33 = arith.mulf %29, %32 : vector<16x64xf32>
    %34 = arith.addf %28, %33 : vector<16x64xf32>
    %c0_9 = arith.constant 0 : index
    %c5 = arith.constant 5 : index
    %35 = vector.load %arg7[%c0_9, %c5] : memref<18x80xf32, #tpu.memory_space<vmem>>, vector<16x64xf32>
    %36 = vector.extract_strided_slice %9 {offsets = [0, 4, 0], sizes = [1, 1, 64], strides = [1, 1, 1]} : vector<3x15x64xf32> to vector<1x1x64xf32>
    %37 = vector.shape_cast %36 : vector<1x1x64xf32> to vector<1x64xf32>
    %38 = vector.broadcast %37 : vector<1x64xf32> to vector<16x64xf32>
    %39 = arith.mulf %35, %38 : vector<16x64xf32>
    %40 = arith.addf %34, %39 : vector<16x64xf32>
    %c0_10 = arith.constant 0 : index
    %c6 = arith.constant 6 : index
    %41 = vector.load %arg7[%c0_10, %c6] : memref<18x80xf32, #tpu.memory_space<vmem>>, vector<16x64xf32>
    %42 = vector.extract_strided_slice %9 {offsets = [0, 5, 0], sizes = [1, 1, 64], strides = [1, 1, 1]} : vector<3x15x64xf32> to vector<1x1x64xf32>
    %43 = vector.shape_cast %42 : vector<1x1x64xf32> to vector<1x64xf32>
    %44 = vector.broadcast %43 : vector<1x64xf32> to vector<16x64xf32>
    %45 = arith.mulf %41, %44 : vector<16x64xf32>
    %46 = arith.addf %40, %45 : vector<16x64xf32>
    %c0_11 = arith.constant 0 : index
    %c7 = arith.constant 7 : index
    %47 = vector.load %arg7[%c0_11, %c7] : memref<18x80xf32, #tpu.memory_space<vmem>>, vector<16x64xf32>
    %48 = vector.extract_strided_slice %9 {offsets = [0, 6, 0], sizes = [1, 1, 64], strides = [1, 1, 1]} : vector<3x15x64xf32> to vector<1x1x64xf32>
    %49 = vector.shape_cast %48 : vector<1x1x64xf32> to vector<1x64xf32>
    %50 = vector.broadcast %49 : vector<1x64xf32> to vector<16x64xf32>
    %51 = arith.mulf %47, %50 : vector<16x64xf32>
    %52 = arith.addf %46, %51 : vector<16x64xf32>
    %c0_12 = arith.constant 0 : index
    %c8 = arith.constant 8 : index
    %53 = vector.load %arg7[%c0_12, %c8] : memref<18x80xf32, #tpu.memory_space<vmem>>, vector<16x64xf32>
    %54 = vector.extract_strided_slice %9 {offsets = [0, 7, 0], sizes = [1, 1, 64], strides = [1, 1, 1]} : vector<3x15x64xf32> to vector<1x1x64xf32>
    %55 = vector.shape_cast %54 : vector<1x1x64xf32> to vector<1x64xf32>
    %56 = vector.broadcast %55 : vector<1x64xf32> to vector<16x64xf32>
    %57 = arith.mulf %53, %56 : vector<16x64xf32>
    %58 = arith.addf %52, %57 : vector<16x64xf32>
    %c0_13 = arith.constant 0 : index
    %c9 = arith.constant 9 : index
    %59 = vector.load %arg7[%c0_13, %c9] : memref<18x80xf32, #tpu.memory_space<vmem>>, vector<16x64xf32>
    %60 = vector.extract_strided_slice %9 {offsets = [0, 8, 0], sizes = [1, 1, 64], strides = [1, 1, 1]} : vector<3x15x64xf32> to vector<1x1x64xf32>
    %61 = vector.shape_cast %60 : vector<1x1x64xf32> to vector<1x64xf32>
    %62 = vector.broadcast %61 : vector<1x64xf32> to vector<16x64xf32>
    %63 = arith.mulf %59, %62 : vector<16x64xf32>
    %64 = arith.addf %58, %63 : vector<16x64xf32>
    %c0_14 = arith.constant 0 : index
    %c10 = arith.constant 10 : index
    %65 = vector.load %arg7[%c0_14, %c10] : memref<18x80xf32, #tpu.memory_space<vmem>>, vector<16x64xf32>
    %66 = vector.extract_strided_slice %9 {offsets = [0, 9, 0], sizes = [1, 1, 64], strides = [1, 1, 1]} : vector<3x15x64xf32> to vector<1x1x64xf32>
    %67 = vector.shape_cast %66 : vector<1x1x64xf32> to vector<1x64xf32>
    %68 = vector.broadcast %67 : vector<1x64xf32> to vector<16x64xf32>
    %69 = arith.mulf %65, %68 : vector<16x64xf32>
    %70 = arith.addf %64, %69 : vector<16x64xf32>
    %c0_15 = arith.constant 0 : index
    %c11 = arith.constant 11 : index
    %71 = vector.load %arg7[%c0_15, %c11] : memref<18x80xf32, #tpu.memory_space<vmem>>, vector<16x64xf32>
    %72 = vector.extract_strided_slice %9 {offsets = [0, 10, 0], sizes = [1, 1, 64], strides = [1, 1, 1]} : vector<3x15x64xf32> to vector<1x1x64xf32>
    %73 = vector.shape_cast %72 : vector<1x1x64xf32> to vector<1x64xf32>
    %74 = vector.broadcast %73 : vector<1x64xf32> to vector<16x64xf32>
    %75 = arith.mulf %71, %74 : vector<16x64xf32>
    %76 = arith.addf %70, %75 : vector<16x64xf32>
    %c0_16 = arith.constant 0 : index
    %c12 = arith.constant 12 : index
    %77 = vector.load %arg7[%c0_16, %c12] : memref<18x80xf32, #tpu.memory_space<vmem>>, vector<16x64xf32>
    %78 = vector.extract_strided_slice %9 {offsets = [0, 11, 0], sizes = [1, 1, 64], strides = [1, 1, 1]} : vector<3x15x64xf32> to vector<1x1x64xf32>
    %79 = vector.shape_cast %78 : vector<1x1x64xf32> to vector<1x64xf32>
    %80 = vector.broadcast %79 : vector<1x64xf32> to vector<16x64xf32>
    %81 = arith.mulf %77, %80 : vector<16x64xf32>
    %82 = arith.addf %76, %81 : vector<16x64xf32>
    %c0_17 = arith.constant 0 : index
    %c13 = arith.constant 13 : index
    %83 = vector.load %arg7[%c0_17, %c13] : memref<18x80xf32, #tpu.memory_space<vmem>>, vector<16x64xf32>
    %84 = vector.extract_strided_slice %9 {offsets = [0, 12, 0], sizes = [1, 1, 64], strides = [1, 1, 1]} : vector<3x15x64xf32> to vector<1x1x64xf32>
    %85 = vector.shape_cast %84 : vector<1x1x64xf32> to vector<1x64xf32>
    %86 = vector.broadcast %85 : vector<1x64xf32> to vector<16x64xf32>
    %87 = arith.mulf %83, %86 : vector<16x64xf32>
    %88 = arith.addf %82, %87 : vector<16x64xf32>
    %c0_18 = arith.constant 0 : index
    %c14 = arith.constant 14 : index
    %89 = vector.load %arg7[%c0_18, %c14] : memref<18x80xf32, #tpu.memory_space<vmem>>, vector<16x64xf32>
    %90 = vector.extract_strided_slice %9 {offsets = [0, 13, 0], sizes = [1, 1, 64], strides = [1, 1, 1]} : vector<3x15x64xf32> to vector<1x1x64xf32>
    %91 = vector.shape_cast %90 : vector<1x1x64xf32> to vector<1x64xf32>
    %92 = vector.broadcast %91 : vector<1x64xf32> to vector<16x64xf32>
    %93 = arith.mulf %89, %92 : vector<16x64xf32>
    %94 = arith.addf %88, %93 : vector<16x64xf32>
    %c0_19 = arith.constant 0 : index
    %c15 = arith.constant 15 : index
    %95 = vector.load %arg7[%c0_19, %c15] : memref<18x80xf32, #tpu.memory_space<vmem>>, vector<16x64xf32>
    %96 = vector.extract_strided_slice %9 {offsets = [0, 14, 0], sizes = [1, 1, 64], strides = [1, 1, 1]} : vector<3x15x64xf32> to vector<1x1x64xf32>
    %97 = vector.shape_cast %96 : vector<1x1x64xf32> to vector<1x64xf32>
    %98 = vector.broadcast %97 : vector<1x64xf32> to vector<16x64xf32>
    %99 = arith.mulf %95, %98 : vector<16x64xf32>
    %100 = arith.addf %94, %99 : vector<16x64xf32>
    %c1_20 = arith.constant 1 : index
    %c1_21 = arith.constant 1 : index
    %101 = vector.load %arg7[%c1_20, %c1_21] : memref<18x80xf32, #tpu.memory_space<vmem>>, vector<16x64xf32>
    %102 = vector.extract_strided_slice %9 {offsets = [1, 0, 0], sizes = [1, 1, 64], strides = [1, 1, 1]} : vector<3x15x64xf32> to vector<1x1x64xf32>
    %103 = vector.shape_cast %102 : vector<1x1x64xf32> to vector<1x64xf32>
    %104 = vector.broadcast %103 : vector<1x64xf32> to vector<16x64xf32>
    %105 = arith.mulf %101, %104 : vector<16x64xf32>
    %106 = arith.addf %100, %105 : vector<16x64xf32>
    %c1_22 = arith.constant 1 : index
    %c2_23 = arith.constant 2 : index
    %107 = vector.load %arg7[%c1_22, %c2_23] : memref<18x80xf32, #tpu.memory_space<vmem>>, vector<16x64xf32>
    %108 = vector.extract_strided_slice %9 {offsets = [1, 1, 0], sizes = [1, 1, 64], strides = [1, 1, 1]} : vector<3x15x64xf32> to vector<1x1x64xf32>
    %109 = vector.shape_cast %108 : vector<1x1x64xf32> to vector<1x64xf32>
    %110 = vector.broadcast %109 : vector<1x64xf32> to vector<16x64xf32>
    %111 = arith.mulf %107, %110 : vector<16x64xf32>
    %112 = arith.addf %106, %111 : vector<16x64xf32>
    %c1_24 = arith.constant 1 : index
    %c3_25 = arith.constant 3 : index
    %113 = vector.load %arg7[%c1_24, %c3_25] : memref<18x80xf32, #tpu.memory_space<vmem>>, vector<16x64xf32>
    %114 = vector.extract_strided_slice %9 {offsets = [1, 2, 0], sizes = [1, 1, 64], strides = [1, 1, 1]} : vector<3x15x64xf32> to vector<1x1x64xf32>
    %115 = vector.shape_cast %114 : vector<1x1x64xf32> to vector<1x64xf32>
    %116 = vector.broadcast %115 : vector<1x64xf32> to vector<16x64xf32>
    %117 = arith.mulf %113, %116 : vector<16x64xf32>
    %118 = arith.addf %112, %117 : vector<16x64xf32>
    %c1_26 = arith.constant 1 : index
    %c4_27 = arith.constant 4 : index
    %119 = vector.load %arg7[%c1_26, %c4_27] : memref<18x80xf32, #tpu.memory_space<vmem>>, vector<16x64xf32>
    %120 = vector.extract_strided_slice %9 {offsets = [1, 3, 0], sizes = [1, 1, 64], strides = [1, 1, 1]} : vector<3x15x64xf32> to vector<1x1x64xf32>
    %121 = vector.shape_cast %120 : vector<1x1x64xf32> to vector<1x64xf32>
    %122 = vector.broadcast %121 : vector<1x64xf32> to vector<16x64xf32>
    %123 = arith.mulf %119, %122 : vector<16x64xf32>
    %124 = arith.addf %118, %123 : vector<16x64xf32>
    %c1_28 = arith.constant 1 : index
    %c5_29 = arith.constant 5 : index
    %125 = vector.load %arg7[%c1_28, %c5_29] : memref<18x80xf32, #tpu.memory_space<vmem>>, vector<16x64xf32>
    %126 = vector.extract_strided_slice %9 {offsets = [1, 4, 0], sizes = [1, 1, 64], strides = [1, 1, 1]} : vector<3x15x64xf32> to vector<1x1x64xf32>
    %127 = vector.shape_cast %126 : vector<1x1x64xf32> to vector<1x64xf32>
    %128 = vector.broadcast %127 : vector<1x64xf32> to vector<16x64xf32>
    %129 = arith.mulf %125, %128 : vector<16x64xf32>
    %130 = arith.addf %124, %129 : vector<16x64xf32>
    %c1_30 = arith.constant 1 : index
    %c6_31 = arith.constant 6 : index
    %131 = vector.load %arg7[%c1_30, %c6_31] : memref<18x80xf32, #tpu.memory_space<vmem>>, vector<16x64xf32>
    %132 = vector.extract_strided_slice %9 {offsets = [1, 5, 0], sizes = [1, 1, 64], strides = [1, 1, 1]} : vector<3x15x64xf32> to vector<1x1x64xf32>
    %133 = vector.shape_cast %132 : vector<1x1x64xf32> to vector<1x64xf32>
    %134 = vector.broadcast %133 : vector<1x64xf32> to vector<16x64xf32>
    %135 = arith.mulf %131, %134 : vector<16x64xf32>
    %136 = arith.addf %130, %135 : vector<16x64xf32>
    %c1_32 = arith.constant 1 : index
    %c7_33 = arith.constant 7 : index
    %137 = vector.load %arg7[%c1_32, %c7_33] : memref<18x80xf32, #tpu.memory_space<vmem>>, vector<16x64xf32>
    %138 = vector.extract_strided_slice %9 {offsets = [1, 6, 0], sizes = [1, 1, 64], strides = [1, 1, 1]} : vector<3x15x64xf32> to vector<1x1x64xf32>
    %139 = vector.shape_cast %138 : vector<1x1x64xf32> to vector<1x64xf32>
    %140 = vector.broadcast %139 : vector<1x64xf32> to vector<16x64xf32>
    %141 = arith.mulf %137, %140 : vector<16x64xf32>
    %142 = arith.addf %136, %141 : vector<16x64xf32>
    %c1_34 = arith.constant 1 : index
    %c8_35 = arith.constant 8 : index
    %143 = vector.load %arg7[%c1_34, %c8_35] : memref<18x80xf32, #tpu.memory_space<vmem>>, vector<16x64xf32>
    %144 = vector.extract_strided_slice %9 {offsets = [1, 7, 0], sizes = [1, 1, 64], strides = [1, 1, 1]} : vector<3x15x64xf32> to vector<1x1x64xf32>
    %145 = vector.shape_cast %144 : vector<1x1x64xf32> to vector<1x64xf32>
    %146 = vector.broadcast %145 : vector<1x64xf32> to vector<16x64xf32>
    %147 = arith.mulf %143, %146 : vector<16x64xf32>
    %148 = arith.addf %142, %147 : vector<16x64xf32>
    %c1_36 = arith.constant 1 : index
    %c9_37 = arith.constant 9 : index
    %149 = vector.load %arg7[%c1_36, %c9_37] : memref<18x80xf32, #tpu.memory_space<vmem>>, vector<16x64xf32>
    %150 = vector.extract_strided_slice %9 {offsets = [1, 8, 0], sizes = [1, 1, 64], strides = [1, 1, 1]} : vector<3x15x64xf32> to vector<1x1x64xf32>
    %151 = vector.shape_cast %150 : vector<1x1x64xf32> to vector<1x64xf32>
    %152 = vector.broadcast %151 : vector<1x64xf32> to vector<16x64xf32>
    %153 = arith.mulf %149, %152 : vector<16x64xf32>
    %154 = arith.addf %148, %153 : vector<16x64xf32>
    %c1_38 = arith.constant 1 : index
    %c10_39 = arith.constant 10 : index
    %155 = vector.load %arg7[%c1_38, %c10_39] : memref<18x80xf32, #tpu.memory_space<vmem>>, vector<16x64xf32>
    %156 = vector.extract_strided_slice %9 {offsets = [1, 9, 0], sizes = [1, 1, 64], strides = [1, 1, 1]} : vector<3x15x64xf32> to vector<1x1x64xf32>
    %157 = vector.shape_cast %156 : vector<1x1x64xf32> to vector<1x64xf32>
    %158 = vector.broadcast %157 : vector<1x64xf32> to vector<16x64xf32>
    %159 = arith.mulf %155, %158 : vector<16x64xf32>
    %160 = arith.addf %154, %159 : vector<16x64xf32>
    %c1_40 = arith.constant 1 : index
    %c11_41 = arith.constant 11 : index
    %161 = vector.load %arg7[%c1_40, %c11_41] : memref<18x80xf32, #tpu.memory_space<vmem>>, vector<16x64xf32>
    %162 = vector.extract_strided_slice %9 {offsets = [1, 10, 0], sizes = [1, 1, 64], strides = [1, 1, 1]} : vector<3x15x64xf32> to vector<1x1x64xf32>
    %163 = vector.shape_cast %162 : vector<1x1x64xf32> to vector<1x64xf32>
    %164 = vector.broadcast %163 : vector<1x64xf32> to vector<16x64xf32>
    %165 = arith.mulf %161, %164 : vector<16x64xf32>
    %166 = arith.addf %160, %165 : vector<16x64xf32>
    %c1_42 = arith.constant 1 : index
    %c12_43 = arith.constant 12 : index
    %167 = vector.load %arg7[%c1_42, %c12_43] : memref<18x80xf32, #tpu.memory_space<vmem>>, vector<16x64xf32>
    %168 = vector.extract_strided_slice %9 {offsets = [1, 11, 0], sizes = [1, 1, 64], strides = [1, 1, 1]} : vector<3x15x64xf32> to vector<1x1x64xf32>
    %169 = vector.shape_cast %168 : vector<1x1x64xf32> to vector<1x64xf32>
    %170 = vector.broadcast %169 : vector<1x64xf32> to vector<16x64xf32>
    %171 = arith.mulf %167, %170 : vector<16x64xf32>
    %172 = arith.addf %166, %171 : vector<16x64xf32>
    %c1_44 = arith.constant 1 : index
    %c13_45 = arith.constant 13 : index
    %173 = vector.load %arg7[%c1_44, %c13_45] : memref<18x80xf32, #tpu.memory_space<vmem>>, vector<16x64xf32>
    %174 = vector.extract_strided_slice %9 {offsets = [1, 12, 0], sizes = [1, 1, 64], strides = [1, 1, 1]} : vector<3x15x64xf32> to vector<1x1x64xf32>
    %175 = vector.shape_cast %174 : vector<1x1x64xf32> to vector<1x64xf32>
    %176 = vector.broadcast %175 : vector<1x64xf32> to vector<16x64xf32>
    %177 = arith.mulf %173, %176 : vector<16x64xf32>
    %178 = arith.addf %172, %177 : vector<16x64xf32>
    %c1_46 = arith.constant 1 : index
    %c14_47 = arith.constant 14 : index
    %179 = vector.load %arg7[%c1_46, %c14_47] : memref<18x80xf32, #tpu.memory_space<vmem>>, vector<16x64xf32>
    %180 = vector.extract_strided_slice %9 {offsets = [1, 13, 0], sizes = [1, 1, 64], strides = [1, 1, 1]} : vector<3x15x64xf32> to vector<1x1x64xf32>
    %181 = vector.shape_cast %180 : vector<1x1x64xf32> to vector<1x64xf32>
    %182 = vector.broadcast %181 : vector<1x64xf32> to vector<16x64xf32>
    %183 = arith.mulf %179, %182 : vector<16x64xf32>
    %184 = arith.addf %178, %183 : vector<16x64xf32>
    %c1_48 = arith.constant 1 : index
    %c15_49 = arith.constant 15 : index
    %185 = vector.load %arg7[%c1_48, %c15_49] : memref<18x80xf32, #tpu.memory_space<vmem>>, vector<16x64xf32>
    %186 = vector.extract_strided_slice %9 {offsets = [1, 14, 0], sizes = [1, 1, 64], strides = [1, 1, 1]} : vector<3x15x64xf32> to vector<1x1x64xf32>
    %187 = vector.shape_cast %186 : vector<1x1x64xf32> to vector<1x64xf32>
    %188 = vector.broadcast %187 : vector<1x64xf32> to vector<16x64xf32>
    %189 = arith.mulf %185, %188 : vector<16x64xf32>
    %190 = arith.addf %184, %189 : vector<16x64xf32>
    %c2_50 = arith.constant 2 : index
    %c1_51 = arith.constant 1 : index
    %191 = vector.load %arg7[%c2_50, %c1_51] : memref<18x80xf32, #tpu.memory_space<vmem>>, vector<16x64xf32>
    %192 = vector.extract_strided_slice %9 {offsets = [2, 0, 0], sizes = [1, 1, 64], strides = [1, 1, 1]} : vector<3x15x64xf32> to vector<1x1x64xf32>
    %193 = vector.shape_cast %192 : vector<1x1x64xf32> to vector<1x64xf32>
    %194 = vector.broadcast %193 : vector<1x64xf32> to vector<16x64xf32>
    %195 = arith.mulf %191, %194 : vector<16x64xf32>
    %196 = arith.addf %190, %195 : vector<16x64xf32>
    %c2_52 = arith.constant 2 : index
    %c2_53 = arith.constant 2 : index
    %197 = vector.load %arg7[%c2_52, %c2_53] : memref<18x80xf32, #tpu.memory_space<vmem>>, vector<16x64xf32>
    %198 = vector.extract_strided_slice %9 {offsets = [2, 1, 0], sizes = [1, 1, 64], strides = [1, 1, 1]} : vector<3x15x64xf32> to vector<1x1x64xf32>
    %199 = vector.shape_cast %198 : vector<1x1x64xf32> to vector<1x64xf32>
    %200 = vector.broadcast %199 : vector<1x64xf32> to vector<16x64xf32>
    %201 = arith.mulf %197, %200 : vector<16x64xf32>
    %202 = arith.addf %196, %201 : vector<16x64xf32>
    %c2_54 = arith.constant 2 : index
    %c3_55 = arith.constant 3 : index
    %203 = vector.load %arg7[%c2_54, %c3_55] : memref<18x80xf32, #tpu.memory_space<vmem>>, vector<16x64xf32>
    %204 = vector.extract_strided_slice %9 {offsets = [2, 2, 0], sizes = [1, 1, 64], strides = [1, 1, 1]} : vector<3x15x64xf32> to vector<1x1x64xf32>
    %205 = vector.shape_cast %204 : vector<1x1x64xf32> to vector<1x64xf32>
    %206 = vector.broadcast %205 : vector<1x64xf32> to vector<16x64xf32>
    %207 = arith.mulf %203, %206 : vector<16x64xf32>
    %208 = arith.addf %202, %207 : vector<16x64xf32>
    %c2_56 = arith.constant 2 : index
    %c4_57 = arith.constant 4 : index
    %209 = vector.load %arg7[%c2_56, %c4_57] : memref<18x80xf32, #tpu.memory_space<vmem>>, vector<16x64xf32>
    %210 = vector.extract_strided_slice %9 {offsets = [2, 3, 0], sizes = [1, 1, 64], strides = [1, 1, 1]} : vector<3x15x64xf32> to vector<1x1x64xf32>
    %211 = vector.shape_cast %210 : vector<1x1x64xf32> to vector<1x64xf32>
    %212 = vector.broadcast %211 : vector<1x64xf32> to vector<16x64xf32>
    %213 = arith.mulf %209, %212 : vector<16x64xf32>
    %214 = arith.addf %208, %213 : vector<16x64xf32>
    %c2_58 = arith.constant 2 : index
    %c5_59 = arith.constant 5 : index
    %215 = vector.load %arg7[%c2_58, %c5_59] : memref<18x80xf32, #tpu.memory_space<vmem>>, vector<16x64xf32>
    %216 = vector.extract_strided_slice %9 {offsets = [2, 4, 0], sizes = [1, 1, 64], strides = [1, 1, 1]} : vector<3x15x64xf32> to vector<1x1x64xf32>
    %217 = vector.shape_cast %216 : vector<1x1x64xf32> to vector<1x64xf32>
    %218 = vector.broadcast %217 : vector<1x64xf32> to vector<16x64xf32>
    %219 = arith.mulf %215, %218 : vector<16x64xf32>
    %220 = arith.addf %214, %219 : vector<16x64xf32>
    %c2_60 = arith.constant 2 : index
    %c6_61 = arith.constant 6 : index
    %221 = vector.load %arg7[%c2_60, %c6_61] : memref<18x80xf32, #tpu.memory_space<vmem>>, vector<16x64xf32>
    %222 = vector.extract_strided_slice %9 {offsets = [2, 5, 0], sizes = [1, 1, 64], strides = [1, 1, 1]} : vector<3x15x64xf32> to vector<1x1x64xf32>
    %223 = vector.shape_cast %222 : vector<1x1x64xf32> to vector<1x64xf32>
    %224 = vector.broadcast %223 : vector<1x64xf32> to vector<16x64xf32>
    %225 = arith.mulf %221, %224 : vector<16x64xf32>
    %226 = arith.addf %220, %225 : vector<16x64xf32>
    %c2_62 = arith.constant 2 : index
    %c7_63 = arith.constant 7 : index
    %227 = vector.load %arg7[%c2_62, %c7_63] : memref<18x80xf32, #tpu.memory_space<vmem>>, vector<16x64xf32>
    %228 = vector.extract_strided_slice %9 {offsets = [2, 6, 0], sizes = [1, 1, 64], strides = [1, 1, 1]} : vector<3x15x64xf32> to vector<1x1x64xf32>
    %229 = vector.shape_cast %228 : vector<1x1x64xf32> to vector<1x64xf32>
    %230 = vector.broadcast %229 : vector<1x64xf32> to vector<16x64xf32>
    %231 = arith.mulf %227, %230 : vector<16x64xf32>
    %232 = arith.addf %226, %231 : vector<16x64xf32>
    %c2_64 = arith.constant 2 : index
    %c8_65 = arith.constant 8 : index
    %233 = vector.load %arg7[%c2_64, %c8_65] : memref<18x80xf32, #tpu.memory_space<vmem>>, vector<16x64xf32>
    %234 = vector.extract_strided_slice %9 {offsets = [2, 7, 0], sizes = [1, 1, 64], strides = [1, 1, 1]} : vector<3x15x64xf32> to vector<1x1x64xf32>
    %235 = vector.shape_cast %234 : vector<1x1x64xf32> to vector<1x64xf32>
    %236 = vector.broadcast %235 : vector<1x64xf32> to vector<16x64xf32>
    %237 = arith.mulf %233, %236 : vector<16x64xf32>
    %238 = arith.addf %232, %237 : vector<16x64xf32>
    %c2_66 = arith.constant 2 : index
    %c9_67 = arith.constant 9 : index
    %239 = vector.load %arg7[%c2_66, %c9_67] : memref<18x80xf32, #tpu.memory_space<vmem>>, vector<16x64xf32>
    %240 = vector.extract_strided_slice %9 {offsets = [2, 8, 0], sizes = [1, 1, 64], strides = [1, 1, 1]} : vector<3x15x64xf32> to vector<1x1x64xf32>
    %241 = vector.shape_cast %240 : vector<1x1x64xf32> to vector<1x64xf32>
    %242 = vector.broadcast %241 : vector<1x64xf32> to vector<16x64xf32>
    %243 = arith.mulf %239, %242 : vector<16x64xf32>
    %244 = arith.addf %238, %243 : vector<16x64xf32>
    %c2_68 = arith.constant 2 : index
    %c10_69 = arith.constant 10 : index
    %245 = vector.load %arg7[%c2_68, %c10_69] : memref<18x80xf32, #tpu.memory_space<vmem>>, vector<16x64xf32>
    %246 = vector.extract_strided_slice %9 {offsets = [2, 9, 0], sizes = [1, 1, 64], strides = [1, 1, 1]} : vector<3x15x64xf32> to vector<1x1x64xf32>
    %247 = vector.shape_cast %246 : vector<1x1x64xf32> to vector<1x64xf32>
    %248 = vector.broadcast %247 : vector<1x64xf32> to vector<16x64xf32>
    %249 = arith.mulf %245, %248 : vector<16x64xf32>
    %250 = arith.addf %244, %249 : vector<16x64xf32>
    %c2_70 = arith.constant 2 : index
    %c11_71 = arith.constant 11 : index
    %251 = vector.load %arg7[%c2_70, %c11_71] : memref<18x80xf32, #tpu.memory_space<vmem>>, vector<16x64xf32>
    %252 = vector.extract_strided_slice %9 {offsets = [2, 10, 0], sizes = [1, 1, 64], strides = [1, 1, 1]} : vector<3x15x64xf32> to vector<1x1x64xf32>
    %253 = vector.shape_cast %252 : vector<1x1x64xf32> to vector<1x64xf32>
    %254 = vector.broadcast %253 : vector<1x64xf32> to vector<16x64xf32>
    %255 = arith.mulf %251, %254 : vector<16x64xf32>
    %256 = arith.addf %250, %255 : vector<16x64xf32>
    %c2_72 = arith.constant 2 : index
    %c12_73 = arith.constant 12 : index
    %257 = vector.load %arg7[%c2_72, %c12_73] : memref<18x80xf32, #tpu.memory_space<vmem>>, vector<16x64xf32>
    %258 = vector.extract_strided_slice %9 {offsets = [2, 11, 0], sizes = [1, 1, 64], strides = [1, 1, 1]} : vector<3x15x64xf32> to vector<1x1x64xf32>
    %259 = vector.shape_cast %258 : vector<1x1x64xf32> to vector<1x64xf32>
    %260 = vector.broadcast %259 : vector<1x64xf32> to vector<16x64xf32>
    %261 = arith.mulf %257, %260 : vector<16x64xf32>
    %262 = arith.addf %256, %261 : vector<16x64xf32>
    %c2_74 = arith.constant 2 : index
    %c13_75 = arith.constant 13 : index
    %263 = vector.load %arg7[%c2_74, %c13_75] : memref<18x80xf32, #tpu.memory_space<vmem>>, vector<16x64xf32>
    %264 = vector.extract_strided_slice %9 {offsets = [2, 12, 0], sizes = [1, 1, 64], strides = [1, 1, 1]} : vector<3x15x64xf32> to vector<1x1x64xf32>
    %265 = vector.shape_cast %264 : vector<1x1x64xf32> to vector<1x64xf32>
    %266 = vector.broadcast %265 : vector<1x64xf32> to vector<16x64xf32>
    %267 = arith.mulf %263, %266 : vector<16x64xf32>
    %268 = arith.addf %262, %267 : vector<16x64xf32>
    %c2_76 = arith.constant 2 : index
    %c14_77 = arith.constant 14 : index
    %269 = vector.load %arg7[%c2_76, %c14_77] : memref<18x80xf32, #tpu.memory_space<vmem>>, vector<16x64xf32>
    %270 = vector.extract_strided_slice %9 {offsets = [2, 13, 0], sizes = [1, 1, 64], strides = [1, 1, 1]} : vector<3x15x64xf32> to vector<1x1x64xf32>
    %271 = vector.shape_cast %270 : vector<1x1x64xf32> to vector<1x64xf32>
    %272 = vector.broadcast %271 : vector<1x64xf32> to vector<16x64xf32>
    %273 = arith.mulf %269, %272 : vector<16x64xf32>
    %274 = arith.addf %268, %273 : vector<16x64xf32>
    %c2_78 = arith.constant 2 : index
    %c15_79 = arith.constant 15 : index
    %275 = vector.load %arg7[%c2_78, %c15_79] : memref<18x80xf32, #tpu.memory_space<vmem>>, vector<16x64xf32>
    %276 = vector.extract_strided_slice %9 {offsets = [2, 14, 0], sizes = [1, 1, 64], strides = [1, 1, 1]} : vector<3x15x64xf32> to vector<1x1x64xf32>
    %277 = vector.shape_cast %276 : vector<1x1x64xf32> to vector<1x64xf32>
    %278 = vector.broadcast %277 : vector<1x64xf32> to vector<16x64xf32>
    %279 = arith.mulf %275, %278 : vector<16x64xf32>
    %280 = arith.addf %274, %279 : vector<16x64xf32>
    %c0_80 = arith.constant 0 : index
    %c0_81 = arith.constant 0 : index
    %281 = vector.load %arg4[%c0_80, %c0_81] : memref<1x64xf32, #tpu.memory_space<vmem>>, vector<1x64xf32>
    %282 = vector.broadcast %281 : vector<1x64xf32> to vector<16x64xf32>
    %283 = arith.addf %280, %282 : vector<16x64xf32>
    %cst_82 = arith.constant 0.000000e+00 : f32
    %284 = vector.broadcast %cst_82 : f32 to vector<16x64xf32>
    %285 = arith.maximumf %283, %284 : vector<16x64xf32>
    %c0_83 = arith.constant 0 : index
    %c0_84 = arith.constant 0 : index
    %c0_85 = arith.constant 0 : index
    %286 = vector.load %arg5[%c0_83, %c0_84, %c0_85] : memref<1x16x64xf32, #tpu.memory_space<vmem>>, vector<1x16x64xf32>
    %287 = vector.shape_cast %286 : vector<1x16x64xf32> to vector<16x64xf32>
    %288 = vector.shape_cast %285 : vector<16x64xf32> to vector<1x16x64xf32>
    tpu.vector_store %arg5[%c0_83, %c0_84, %c0_85], %288 {strides = array<i32>} : memref<1x16x64xf32, #tpu.memory_space<vmem>>, vector<1x16x64xf32>,
    %cst_86 = arith.constant dense<0.000000e+00> : vector<64xf32>
    %289 = vector.multi_reduction <add>, %285, %cst_86 [0] : vector<16x64xf32> to vector<64xf32>
    %290 = vector.shape_cast %289 : vector<64xf32> to vector<1x64xf32>
    %291 = arith.mulf %285, %285 : vector<16x64xf32>
    %cst_87 = arith.constant dense<0.000000e+00> : vector<64xf32>
    %292 = vector.multi_reduction <add>, %291, %cst_87 [0] : vector<16x64xf32> to vector<64xf32>
    %293 = vector.shape_cast %292 : vector<64xf32> to vector<1x64xf32>
    %294 = tpu.concatenate %290, %293 in 0 : vector<1x64xf32>, vector<1x64xf32> -> vector<2x64xf32>
    %c0_88 = arith.constant 0 : index
    %c0_89 = arith.constant 0 : index
    %c0_90 = arith.constant 0 : index
    %c0_91 = arith.constant 0 : index
    %295 = vector.load %arg6[%c0_88, %c0_89, %c0_90, %c0_91] : memref<1x1x2x64xf32, #tpu.memory_space<vmem>>, vector<1x1x2x64xf32>
    %296 = vector.shape_cast %295 : vector<1x1x2x64xf32> to vector<2x64xf32>
    %297 = vector.shape_cast %294 : vector<2x64xf32> to vector<1x1x2x64xf32>
    tpu.vector_store %arg6[%c0_88, %c0_89, %c0_90, %c0_91], %297 {strides = array<i32>} : memref<1x1x2x64xf32, #tpu.memory_space<vmem>>, vector<1x1x2x64xf32>,
    return
  }
  func.func @transform_1(%arg0: i32, %arg1: i32) -> (i32, i32, i32) {
    %c0_i32 = arith.constant 0 : i32
    %c0_i32_0 = arith.constant 0 : i32
    %c0_i32_1 = arith.constant 0 : i32
    %c0_i32_2 = arith.constant 0 : i32
    return %c0_i32, %c0_i32_0, %c0_i32_1 : i32, i32, i32
  }
  func.func @transform_2(%arg0: i32, %arg1: i32) -> (i32, i32) {
    %c0_i32 = arith.constant 0 : i32
    %c0_i32_0 = arith.constant 0 : i32
    %c0_i32_1 = arith.constant 0 : i32
    return %c0_i32, %c0_i32_0 : i32, i32
  }
  func.func @transform_3(%arg0: i32, %arg1: i32) -> (i32, i32, i32) {
    %c0_i32 = arith.constant 0 : i32
    %c0_i32_0 = arith.constant 0 : i32
    return %arg0, %arg1, %c0_i32 : i32, i32, i32
  }
  func.func @transform_4(%arg0: i32, %arg1: i32) -> (i32, i32, i32, i32) {
    %c0_i32 = arith.constant 0 : i32
    %c0_i32_0 = arith.constant 0 : i32
    %c0_i32_1 = arith.constant 0 : i32
    return %arg0, %arg1, %c0_i32, %c0_i32_0 : i32, i32, i32, i32
  }
}

</mosaic_0001>

<bundles_post_ra>
// kernel: tpu_custom_call.1
= control target key start
LH: loop header
LB: loop body
LE: loop exit
PB: predicated region body
PF: predicated region fallthrough
CT: control target
= control target key end

     0   :  { %s1945_s0 = inlined_call_operand.hbm [shape: f32[36,80], index: 0, kind: input, shape index: {}]   ;;  %s1946_s1 = inlined_call_operand.hbm [shape: f32[3,15,64], index: 1, kind: input, shape index: {}]   ;;  %s1947_s2 = inlined_call_operand.vmem [shape: f32[1,64], index: 2, kind: input, shape index: {}]   ;;  %s1948_s3 = inlined_call_operand.hbm [shape: f32[2,16,64], index: 3, kind: output, shape index: {0}]   ;;  %s1949_s4 = inlined_call_operand.hbm [shape: f32[2,1,2,64], index: 4, kind: output, shape index: {1}]  }
   0x1   :  { %2001 = sst [smem:[#allocation20_spill]] %s1945_s0 }
   0x2   :  { %2002 = sst [smem:[#allocation21_spill]] %s1946_s1 }
   0x3   :  { %10 = vsyncpa [#allocation5], 0 }
   0x4   :  { %11 = vsyncpa [#allocation6], 0 }
   0x5   :  { %13 = vsyncpa [#allocation6 + $0x1], 0 }
   0x6   :  { %14 = vsyncpa [#allocation9], 0 }
   0x7   :  { %16 = vsyncpa [#allocation9 + $0x1], 0  ;;  %s1526_s15 = smov 0   ;;  %s1528_s16 = smov 0  }
   0x8   :  { %s1530_s17 = smov 0   ;;  %s1532_s18 = smov 0  }
   0x9   :  { %s1534_s19 = smov 0   ;;  %s1536_s20 = smov 0  }
   0xa LB: > { %2003 = sst [smem:[#allocation18_spill]] %s1461_s19  ;;  %s1173_s21 = sadd.s32 4294967295, %s1465_s20   ;;  %s1465_s20 = sphi %s1536_s20, %s22_s20   ;;  %s1461_s19 = sphi %s1534_s19, %s2038_s19   ;;  %s1457_s18 = sphi %s1532_s18, %s2037_s18   ;;  %s1453_s17 = sphi %s1530_s17, %s2041_s17   ;;  %s1449_s16 = sphi %s1528_s16, %s2040_s16   ;;  %s1445_s15 = sphi %s1526_s15, %s2039_s15  }
   0xb   : > { %s1174_s22 = sadd.s32 4294967294, %s1465_s20   ;;  %s34_s23 = sadd.s32 1, %s1461_s19 }
   0xc   : > { %s85_s24 = sadd.s32 1, %s1453_s17  ;;  %p36_p0 = scmp.ge.s32.totalorder %s34_s23, 2 }
   0xd   : > { %p95_p1 = scmp.ne.s32.totalorder %s1453_s17, %s1449_s16  ;;  %p96_p2 = scmp.eq.s32.totalorder %s1173_s21, 1 }
   0xe   : > { %p101_p3 = scmp.ne.s32.totalorder %s1449_s16, %s1445_s15  ;;  %s2043_s23 = smov (%p36_p0, %s34_s23), 0 }
   0xf   : > { %2004 = sst [smem:[#allocation19_spill]] %s2043_s23  ;;  %p1566_p4 = por %p96_p2, %p95_p1 }
  0x10   : > { %p102_p5 = scmp.eq.s32.totalorder %s1174_s22, 1  ;;  %s80_s26 = ssub.s32 %s1461_s19, %s2043_s23 }
  0x11   : > { %p1175_p6 = scmp.ge.s32.totalorder %s1465_s20, 1  ;;  %p83_p7 = scmp.eq.s32.totalorder %s80_s26, 0 }
  0x12   : > { %p1573_p8 = por %p102_p5, %p101_p3  ;;  %p137_p9 = scmp.lt.s32.totalorder %s1465_s20, 3 }
  0x13   : > { %s1579_s28 = scalar_select %p83_p7, %s1453_s17, %s85_s24  }
  0x14   : > { %p138_p10 = pnand %p1175_p6, %p137_p9  ;;  %p1209_p11 = scmp.eq.s32.totalorder %s1173_s21, 0 }
  0x15   : > { %s2007_s1 = sld [smem:[#allocation21_spill]]  ;;  %s1467_s6 = smov [#allocation4]  }
  0x16   : > { %p1198_p12 = pneg %p138_p10  ;;  %s150_s7 = sshll.u32 %s1467_s6, 4  ;;  %s151_s7 = int_to_ptr.vmem [resolvable:$true] %s150_s7 }
  0x17   : > { %s1468_s8 = smov 128   ;;  %s1469_s9 = smov 8  }
  0x18   : > { %p1199_p13 = pnand %p1209_p11, %p1198_p12  ;;  %169 = sbr.rel (%p138_p10) target bundleno = 886 (0x376), region = 28 }
  0x1b   : > { %s148_s5 = sshll.u32 %s2007_s1, 4  ;;  %s149_s5 = int_to_ptr.hbm [resolvable:$true] %s148_s5 }
  0x1c   : > { %1201 = dma.hbm_to_vmem [thread:$0]  (!%p1199_p13), %s149_s5, 768, %s151_s7, [#allocation5], %s1468_s8, %s1468_s8, %s1469_s9  }
  0x1d   : > { %1430 = dma.done.wait (%p1209_p11), [#allocation5], 768  }
  0x1e   : > { %1432 = vsyncadd (%p1209_p11), [#allocation5], 4294966528  ;;  %s1585_s10 = sand.u32 1, %s1449_s16   ;;  %s195_s11 = smul.u32 18, %s1457_s18 }
  0x1f   : > { %s1179_s12 = sshll.u32 %s1585_s10, 4  ;;  %s1180_s13 = sshll.u32 %s1585_s10, 1 }
  0x20   : > { %s2008_s0 = sld [smem:[#allocation20_spill]]  ;;  %s1470_s26 = smov [#allocation2]  }
  0x21   : > { %s208_s29 = sshll.u32 %s1470_s26, 4  ;;  %s209_s29 = int_to_ptr.vmem [resolvable:$true] %s208_s29 }
  0x26   : > { %s198_s22 = scalar_lea.hbm %s2008_s0, %s195_s11  ;;  %s1329_s8 = scalar_lea.hbm %s2008_s0, 40 }
  0x27   : > { %s206_s24 = sshll.u32 %s198_s22, 4  ;;  %s207_s24 = int_to_ptr.hbm [resolvable:$true] %s206_s24 }
  0x28   : > { %s1325_s30 = sshra.s32 %s207_s24, 4  ;;  %s1326_s30 = int_to_ptr.hbm [resolvable:$true] %s1325_s30 }
  0x29   : > { %s1327_s5 = scalar_lea.hbm %s1326_s30, 18  ;;  %p1330_p1 = scmp.lt.s32.totalorder %s1326_s30, %s2008_s0 }
  0x2a   : > { %p1328_p0 = scmp.ne.s32.totalorder %s1326_s30, %s1327_s5  ;;  %p1331_p2 = scmp.lt.s32.totalorder %s1329_s8, %s1327_s5 }
  0x2c   : > { %p1332_p3 = por %p1331_p2, %p1330_p1 }
  0x2e   : > { %p1333_p5 = pnand %p1332_p3, %p1328_p0 }
  0x30   : > { %1336 = shalt.err (!%p1333_p5)  }
  0x31   : > { %211 = dma.hbm_to_vmem [thread:$0]  %s207_s24, 288, %s209_s29, [#allocation3] }
  0x32   : > { %s1599_s11 = scalar_lea.vmem [#allocation7], %s1179_s12  ;;  %s1601_s14 = scalar_lea.vmem [#allocation8], %s1180_s13 }
  0x33   : > { %1433 = dma.done.wait [#allocation3], 288 }
  0x34   : > { %1434 = vsyncadd [#allocation3], 4294967008  ;;  %v215_v0 = vld [vmem:[#allocation4] sm:$0xff]  ;;  %s1471_s21 = smov 4   ;;  %s1954_s1 = smov 1   ;;  %v1614_v13 = vld [vmem:[#allocation4 + $0x10] sm:$0xff] }
  0x35   : > { %v266_v1 = vperm.slane %v215_v0, 3  ;;  %v223_v2 = vperm.slane %v215_v0, 0  ;;  %v249_v3 = vperm.slane %v215_v0, 2  ;;  %s1952_s22 = smov 3   ;;  %v283_v4 = vperm.slane %v215_v0, 4  ;;  %s1996_s12 = smov 5  }
  0x36   : > { %v232_v5 = vperm.slane %v215_v0, 1  ;;  %s1953_s13 = smov 2   ;;  %v300_v6 = vperm.slane %v215_v0, 5  ;;  %s1997_s24 = smov 6   ;;  %v317_v7 = vperm.slane %v215_v0, 6  ;;  %v334_v8 = vperm.slane %v215_v0, 7 }
  0x37   : > { %268 = vrot.lane.b32.xlu1 %v266_v1, %s1471_s21  ;;  %225 = vrot.lane.b32.xlu0 %v223_v2, %s1954_s1  ;;  %s1998_s26 = smov 7   ;;  %s1992_s29 = smov 8   ;;  %v216_v9 = vld [vmem:[#allocation4 + $0x8] sm:$0x7f]  ;;  %v481_v14 = vperm.slane %v1614_v13, 1  ;;  %v498_v16 = vperm.slane %v1614_v13, 2 }
  0x38   : > { %251 = vrot.lane.b32.xlu2 %v249_v3, %s1952_s22  ;;  %v351_v10 = vperm.slane %v216_v9, 0  ;;  %s1994_s30 = smov 9   ;;  %v368_v11 = vperm.slane %v216_v9, 1  ;;  %s1995_s5 = smov 10   ;;  %v385_v12 = vperm.slane %v216_v9, 2  ;;  %v402_v15 = vperm.slane %v216_v9, 3 }
  0x39   : > { %s1950_s6 = smov 11   ;;  %s1960_s7 = smov 12   ;;  %v419_v17 = vperm.slane %v216_v9, 4  ;;  %v436_v18 = vperm.slane %v216_v9, 5  ;;  %v453_v19 = vperm.slane %v216_v9, 6  ;;  %v1624_v20 = vld [vmem:[#allocation2] sm:$0xff] }
  0x3a   : > { %s1962_s8 = smov 13   ;;  %s1958_s9 = smov 14   ;;  %v1626_v21 = vld [vmem:[#allocation2 + $0x8] sm:$0xff]  ;;  %v472_v25 = vperm.slane %v1614_v13, 0  ;;  %vm989_vm0 = vcmask 531464   ;;  %vm1010_vm1 = vcmask 1040384  }
  0x3b   : > { %v1660_v45 = vld [vmem:[#allocation2 + $0x9] sm:$0xff]  ;;  %v1694_v9 = vld [vmem:[#allocation2 + $0x1] sm:$0xff]  ;;  %s2022_s0 = smov 7   ;;  %s2023_s23 = smov 6   ;;  %vm986_vm2 = vcmask 523264  }
  0x3c   : > { %s2025_s19 = smov 10  }
  0x3f   : > { %285 = vrot.lane.b32.xlu1 %v283_v4, %s1996_s12  ;;  %234 = vrot.lane.b32.xlu0 %v232_v5, %s1953_s13 }
  0x40   : > { %483 = vrot.lane.b32.xlu2 %v481_v14, %s1953_s13  ;;  %s1980_s13 = smov 125   ;;  %v532_v14 = vperm.slane %v1614_v13, 4 }
  0x47   : > { %302 = vrot.lane.b32.xlu1 %v300_v6, %s1997_s24 }
  0x48   : > { %500 = vrot.lane.b32.xlu2 %v498_v16, %s1952_s22  ;;  %s1978_s22 = smov 126  }
  0x4f   : > { %319 = vrot.lane.b32.xlu1 %v317_v7, %s1998_s26 }
  0x57   : > { %336 = vrot.lane.b32.xlu1 %v334_v8, %s1992_s29 }
  0x5f   : > { %353 = vrot.lane.b32.xlu1 %v351_v10, %s1994_s30  ;;  %v515_v10 = vperm.slane %v1614_v13, 3 }
  0x67   : > { %370 = vrot.lane.b32.xlu1 %v368_v11, %s1995_s5 }
  0x6f   : > { %387 = vrot.lane.b32.xlu1 %v385_v12, %s1950_s6  ;;  %s1956_s6 = smov 15  }
  0x77   : > { %404 = vrot.lane.b32.xlu1 %v402_v15, %s1960_s7  ;;  %s1964_s7 = smov 122  }
  0x7f   : > { %421 = vrot.lane.b32.xlu1 %v419_v17, %s1962_s8  ;;  %s1966_s8 = smov 121  }
  0x87   : > { %438 = vrot.lane.b32.xlu1 %v436_v18, %s1958_s9  ;;  %s1970_s9 = smov 123   ;;  %v549_v18 = vperm.slane %v1614_v13, 5 }
  0x8f   : > { %455 = vrot.lane.b32.xlu1 %v453_v19, %s1956_s6  ;;  %s1984_s6 = smov 127  }
  0x92   : > { %v252_v22 = vpop.permute.xlu2 %251 }
  0x93   : > { %v254_v23 = vmul.f32 %v252_v22, %v1624_v20  ;;  %v255_v24 = vmul.f32 %v252_v22, %v1626_v21 }
  0x95   : > { %258 = vrot.lane.b32.xlu2 %v254_v23, %s1978_s22  ;;  %260 = vrot.lane.b32.xlu0 %v255_v24, %s1978_s22  ;;  %v566_v24 = vperm.slane %v1614_v13, 6 }
  0x97   : > { %474 = vrot.lane.b32.xlu1 %v472_v25, %s1954_s1  ;;  %s1982_s1 = smov 124  }
  0x9a   : > { %v484_v46 = vpop.permute.xlu2 %483 }
  0x9b   : > { %v487_v47 = vmul.f32 %v484_v46, %v1660_v45  ;;  %v486_v11 = vmul.f32 %v484_v46, %v1694_v9 }
  0xa2   : > { %v501_v51 = vpop.permute.xlu2 %500 }
  0xa3   : > { %v504_v52 = vmul.f32 %v501_v51, %v1660_v45  ;;  %v503_v15 = vmul.f32 %v501_v51, %v1694_v9 }
  0xa9   : > { %v269_v26 = vpop.permute.xlu1 %268  ;;  %v1634_v27 = vpop.permute.xlu0 %225 }
  0xaa   : > { %v271_v28 = vmul.f32 %v269_v26, %v1624_v20  ;;  %v272_v29 = vmul.f32 %v269_v26, %v1626_v21  ;;  %v228_v25 = vmul.f32 %v1634_v27, %v1624_v20 }
  0xac   : > { %275 = vrot.lane.b32.xlu2 %v271_v28, %s1980_s13  ;;  %277 = vrot.lane.b32.xlu0 %v272_v29, %s1980_s13 }
  0xb1   : > { %v286_v30 = vpop.permute.xlu1 %285  ;;  %v235_v31 = vpop.permute.xlu0 %234 }
  0xb2   : > { %v288_v32 = vmul.f32 %v286_v30, %v1624_v20  ;;  %v289_v33 = vmul.f32 %v286_v30, %v1626_v21  ;;  %v237_v34 = vmul.f32 %v235_v31, %v1624_v20  ;;  %v238_v35 = vmul.f32 %v235_v31, %v1626_v21 }
  0xb3   : > { %v583_v31 = vperm.slane %v1614_v13, 7 }
  0xb4   : > { %292 = vrot.lane.b32.xlu2 %v288_v32, %s1982_s1  ;;  %294 = vrot.lane.b32.xlu0 %v289_v33, %s1982_s1  ;;  %v229_v33 = vmul.f32 %v1634_v27, %v1626_v21 }
  0xb5   : > { %241 = vrot.lane.b32.xlu1 %v237_v34, %s1984_s6 }
  0xb9   : > { %v303_v36 = vpop.permute.xlu1 %302 }
  0xba   : > { %v305_v37 = vmul.f32 %v303_v36, %v1624_v20  ;;  %v306_v38 = vmul.f32 %v303_v36, %v1626_v21 }
  0xbc   : > { %309 = vrot.lane.b32.xlu2 %v305_v37, %s1970_s9  ;;  %311 = vrot.lane.b32.xlu0 %v306_v38, %s1970_s9  ;;  %s1976_s9 = smov 117  }
  0xbd   : > { %243 = vrot.lane.b32.xlu1 %v238_v35, %s1984_s6  ;;  %v1716_v35 = vld [vmem:[#allocation4 + $0x18] sm:$0x7f] }
  0xc1   : > { %v320_v39 = vpop.permute.xlu1 %319 }
  0xc2   : > { %v322_v40 = vmul.f32 %v320_v39, %v1624_v20  ;;  %v323_v41 = vmul.f32 %v320_v39, %v1626_v21 }
  0xc4   : > { %326 = vrot.lane.b32.xlu2 %v322_v40, %s1964_s7  ;;  %328 = vrot.lane.b32.xlu0 %v323_v41, %s1964_s7  ;;  %s1968_s7 = smov 120   ;;  %v600_v41 = vperm.slane %v1716_v35, 0 }
  0xc5   : > { %492 = vrot.lane.b32.xlu1 %v487_v47, %s1984_s6 }
  0xc9   : > { %v337_v42 = vpop.permute.xlu1 %336 }
  0xca   : > { %v339_v43 = vmul.f32 %v337_v42, %v1624_v20  ;;  %v340_v44 = vmul.f32 %v337_v42, %v1626_v21 }
  0xcc   : > { %343 = vrot.lane.b32.xlu2 %v339_v43, %s1966_s8  ;;  %345 = vrot.lane.b32.xlu0 %v340_v44, %s1966_s8  ;;  %s1972_s8 = smov 119  }
  0xcd   : > { %509 = vrot.lane.b32.xlu1 %v504_v52, %s1978_s22 }
  0xd1   : > { %v354_v48 = vpop.permute.xlu1 %353 }
  0xd2   : > { %v356_v49 = vmul.f32 %v354_v48, %v1624_v20  ;;  %v357_v50 = vmul.f32 %v354_v48, %v1626_v21 }
  0xd4   : > { %360 = vrot.lane.b32.xlu2 %v356_v49, %s1968_s7  ;;  %362 = vrot.lane.b32.xlu0 %v357_v50, %s1968_s7  ;;  %s1974_s7 = smov 118   ;;  %v617_v50 = vperm.slane %v1716_v35, 1 }
  0xd9   : > { %v371_v53 = vpop.permute.xlu1 %370 }
  0xda   : > { %v373_v54 = vmul.f32 %v371_v53, %v1624_v20  ;;  %v374_v55 = vmul.f32 %v371_v53, %v1626_v21 }
  0xdc   : > { %377 = vrot.lane.b32.xlu2 %v373_v54, %s1972_s8  ;;  %379 = vrot.lane.b32.xlu0 %v374_v55, %s1972_s8  ;;  %s1990_s8 = smov 116  }
  0xe1   : > { %v388_v56 = vpop.permute.xlu1 %387 }
  0xe2   : > { %v390_v57 = vmul.f32 %v388_v56, %v1624_v20  ;;  %v391_v58 = vmul.f32 %v388_v56, %v1626_v21  ;;  %v634_v56 = vperm.slane %v1716_v35, 2 }
  0xe4   : > { %394 = vrot.lane.b32.xlu2 %v390_v57, %s1974_s7  ;;  %396 = vrot.lane.b32.xlu0 %v391_v58, %s1974_s7  ;;  %s1988_s7 = smov 115  }
  0xe9   : > { %v405_v59 = vpop.permute.xlu1 %404 }
  0xea   : > { %v407_v60 = vmul.f32 %v405_v59, %v1624_v20  ;;  %v408_v61 = vmul.f32 %v405_v59, %v1626_v21 }
  0xec   : > { %411 = vrot.lane.b32.xlu2 %v407_v60, %s1976_s9  ;;  %413 = vrot.lane.b32.xlu0 %v408_v61, %s1976_s9  ;;  %s1986_s9 = smov 114  }
  0xef   : > { %v259_v4 = vpop.permute.xlu2 %258 }
  0xf1   : > { %v422_v62 = vpop.permute.xlu1 %421 }
  0xf2   : > { %v424_v63 = vmul.f32 %v422_v62, %v1624_v20  ;;  %v425_v0 = vmul.f32 %v422_v62, %v1626_v21 }
  0xf4   : > { %428 = vrot.lane.b32.xlu2 %v424_v63, %s1990_s8  ;;  %430 = vrot.lane.b32.xlu0 %v425_v0, %s1990_s8  ;;  %s2015_s8 = smov 119  }
  0xf9   : > { %v439_v1 = vpop.permute.xlu1 %438 }
  0xfa   : > { %v441_v2 = vmul.f32 %v439_v1, %v1624_v20  ;;  %v442_v3 = vmul.f32 %v439_v1, %v1626_v21 }
  0xfc   : > { %445 = vrot.lane.b32.xlu2 %v441_v2, %s1988_s7  ;;  %447 = vrot.lane.b32.xlu0 %v442_v3, %s1988_s7  ;;  %s2014_s7 = smov 120  }
 0x101   : > { %v456_v5 = vpop.permute.xlu1 %455 }
 0x102   : > { %v458_v6 = vmul.f32 %v456_v5, %v1624_v20  ;;  %v459_v7 = vmul.f32 %v456_v5, %v1626_v21 }
 0x104   : > { %462 = vrot.lane.b32.xlu2 %v458_v6, %s1986_s9  ;;  %464 = vrot.lane.b32.xlu0 %v459_v7, %s1986_s9  ;;  %s2013_s9 = smov 121  }
 0x106   : > { %v276_v8 = vpop.permute.xlu2 %275 }
 0x107   : > { %v261_v16 = vpop.permute.xlu0 %260 }
 0x109   : > { %v1706_v19 = vpop.permute.xlu1 %474 }
 0x10a   : > { %v477_v5 = vmul.f32 %v1706_v19, %v1694_v9 }
 0x10c   : > { %517 = vrot.lane.b32.xlu2 %v515_v10, %s1471_s21  ;;  %490 = vrot.lane.b32.xlu0 %v486_v11, %s1984_s6  ;;  %s2012_s6 = smov 13  }
 0x10e   : > { %v293_v12 = vpop.permute.xlu2 %292 }
 0x114   : > { %534 = vrot.lane.b32.xlu2 %v532_v14, %s1996_s12  ;;  %507 = vrot.lane.b32.xlu0 %v503_v15, %s1978_s22  ;;  %s2009_s22 = smov 11   ;;  %s2019_s12 = smov 15  }
 0x116   : > { %v310_v17 = vpop.permute.xlu2 %309 }
 0x11c   : > { %551 = vrot.lane.b32.xlu2 %v549_v18, %s1997_s24  ;;  %s2020_s24 = smov 2  }
 0x11e   : > { %v327_v22 = vpop.permute.xlu2 %326  ;;  %v278_v23 = vpop.permute.xlu0 %277 }
 0x124   : > { %568 = vrot.lane.b32.xlu2 %v566_v24, %s1998_s26  ;;  %s2021_s26 = smov 3  }
 0x126   : > { %v344_v26 = vpop.permute.xlu2 %343  ;;  %v295_v28 = vpop.permute.xlu0 %294 }
 0x127   : > { %v242_v29 = vpop.permute.xlu1 %241 }
 0x128   : > { %v247_v30 = vadd.f32 %v242_v29, %v228_v25 }
 0x12a   : > { %v264_v32 = vadd.f32 %v259_v4, %v247_v30 }
 0x12c   : > { %v281_v34 = vadd.f32 %v276_v8, %v264_v32  ;;  %585 = vrot.lane.b32.xlu2 %v583_v31, %s1992_s29  ;;  %s2016_s29 = smov 118  }
 0x12e   : > { %v298_v36 = vadd.f32 %v293_v12, %v281_v34  ;;  %v361_v37 = vpop.permute.xlu2 %360  ;;  %v312_v20 = vpop.permute.xlu0 %311 }
 0x12f   : > { %v244_v38 = vpop.permute.xlu1 %243 }
 0x130   : > { %v315_v39 = vadd.f32 %v310_v17, %v298_v36  ;;  %v248_v40 = vadd.f32 %v244_v38, %v229_v33 }
 0x132   : > { %v332_v42 = vadd.f32 %v327_v22, %v315_v39  ;;  %v265_v43 = vadd.f32 %v261_v16, %v248_v40  ;;  %v668_v40 = vperm.slane %v1716_v35, 4 }
 0x134   : > { %v349_v13 = vadd.f32 %v344_v26, %v332_v42  ;;  %v282_v44 = vadd.f32 %v278_v23, %v265_v43  ;;  %602 = vrot.lane.b32.xlu2 %v600_v41, %s1994_s30  ;;  %v478_v26 = vmul.f32 %v1706_v19, %v1660_v45  ;;  %s2017_s30 = smov 12  }
 0x136   : > { %v366_v21 = vadd.f32 %v361_v37, %v349_v13  ;;  %v299_v27 = vadd.f32 %v295_v28, %v282_v44  ;;  %v378_v46 = vpop.permute.xlu2 %377  ;;  %v329_v47 = vpop.permute.xlu0 %328 }
 0x137   : > { %v493_v34 = vpop.permute.xlu1 %492 }
 0x138   : > { %v316_v48 = vadd.f32 %v312_v20, %v299_v27  ;;  %v383_v49 = vadd.f32 %v378_v46, %v366_v21 }
 0x13a   : > { %v333_v51 = vadd.f32 %v329_v47, %v316_v48  ;;  %v651_v48 = vperm.slane %v1716_v35, 3 }
 0x13c   : > { %619 = vrot.lane.b32.xlu2 %v617_v50, %s1995_s5  ;;  %s2018_s5 = smov 14  }
 0x13e   : > { %v395_v52 = vpop.permute.xlu2 %394  ;;  %v346_v53 = vpop.permute.xlu0 %345 }
 0x13f   : > { %v400_v54 = vadd.f32 %v395_v52, %v383_v49  ;;  %v350_v55 = vadd.f32 %v346_v53, %v333_v51  ;;  %v685_v51 = vperm.slane %v1716_v35, 5  ;;  %v702_v52 = vperm.slane %v1716_v35, 6  ;;  %v1766_v53 = vld [vmem:[#allocation4 + $0x20] sm:$0xff] }
 0x140   : > { %v815_v35 = vperm.slane %v1766_v53, 6 }
 0x144   : > { %636 = vrot.lane.b32.xlu2 %v634_v56, %s2009_s22  ;;  %v747_v56 = vperm.slane %v1766_v53, 2 }
 0x146   : > { %v412_v57 = vpop.permute.xlu2 %411  ;;  %v363_v58 = vpop.permute.xlu0 %362 }
 0x147   : > { %v417_v59 = vadd.f32 %v412_v57, %v400_v54  ;;  %v367_v60 = vadd.f32 %v363_v58, %v350_v55  ;;  %v730_v54 = vperm.slane %v1766_v53, 1  ;;  %v764_v55 = vperm.slane %v1766_v53, 3  ;;  %v220_v58 = vld [vmem:[#allocation4 + $0x28] sm:$0x7f] }
 0x148   : > { %v798_v57 = vperm.slane %v1766_v53, 5 }
 0x14c   : > { %670 = vrot.lane.b32.xlu2 %v668_v40, %s2012_s6 }
 0x14e   : > { %v429_v61 = vpop.permute.xlu2 %428  ;;  %v380_v62 = vpop.permute.xlu0 %379 }
 0x14f   : > { %v434_v63 = vadd.f32 %v429_v61, %v417_v59  ;;  %v384_v0 = vadd.f32 %v380_v62, %v367_v60  ;;  %v781_v59 = vperm.slane %v1766_v53, 4  ;;  %v866_v60 = vperm.slane %v220_v58, 1 }
 0x150   : > { %v849_v61 = vperm.slane %v220_v58, 0  ;;  %v917_v62 = vperm.slane %v220_v58, 4 }
 0x154   : > { %732 = vrot.lane.b32.xlu2 %v730_v54, %s2020_s24  ;;  %s2024_s24 = smov 5   ;;  %v721_v54 = vperm.slane %v1766_v53, 0 }
 0x156   : > { %v446_v1 = vpop.permute.xlu2 %445  ;;  %v397_v2 = vpop.permute.xlu0 %396 }
 0x157   : > { %v451_v3 = vadd.f32 %v446_v1, %v434_v63  ;;  %v401_v4 = vadd.f32 %v397_v2, %v384_v0  ;;  %v900_v63 = vperm.slane %v220_v58, 3  ;;  %v832_v0 = vperm.slane %v1766_v53, 7  ;;  %v510_v2 = vpop.permute.xlu1 %509 }
 0x15c   : > { %783 = vrot.lane.b32.xlu2 %v781_v59, %s2024_s24  ;;  %s2036_s24 = smov 124  }
 0x15e   : > { %v463_v6 = vpop.permute.xlu2 %462  ;;  %v414_v7 = vpop.permute.xlu0 %413 }
 0x15f   : > { %v468_v8 = vadd.f32 %v463_v6, %v451_v3  ;;  %v418_v10 = vadd.f32 %v414_v7, %v401_v4  ;;  %v951_v4 = vperm.slane %v220_v58, 6 }
 0x161   : > { %v479_v11 = vadd.f32 %v477_v5, %v468_v8 }
 0x166   : > { %v518_v12 = vpop.permute.xlu2 %517  ;;  %v431_v14 = vpop.permute.xlu0 %430 }
 0x167   : > { %v520_v15 = vmul.f32 %v518_v12, %v1694_v9  ;;  %v521_v16 = vmul.f32 %v518_v12, %v1660_v45  ;;  %v435_v17 = vadd.f32 %v431_v14, %v418_v10  ;;  %v883_v12 = vperm.slane %v220_v58, 2 }
 0x169   : > { %524 = vrot.lane.b32.xlu0 %v520_v15, %s1980_s13  ;;  %526 = vrot.lane.b32.xlu1 %v521_v16, %s1980_s13  ;;  %s2010_s13 = smov 123  }
 0x16e   : > { %v535_v18 = vpop.permute.xlu2 %534  ;;  %v448_v22 = vpop.permute.xlu0 %447 }
 0x16f   : > { %v537_v23 = vmul.f32 %v535_v18, %v1694_v9  ;;  %v538_v24 = vmul.f32 %v535_v18, %v1660_v45  ;;  %v452_v25 = vadd.f32 %v448_v22, %v435_v17 }
 0x171   : > { %541 = vrot.lane.b32.xlu0 %v537_v23, %s1982_s1  ;;  %543 = vrot.lane.b32.xlu1 %v538_v24, %s1982_s1  ;;  %s2011_s1 = smov 122  }
 0x176   : > { %v552_v28 = vpop.permute.xlu2 %551  ;;  %v465_v29 = vpop.permute.xlu0 %464 }
 0x177   : > { %v554_v30 = vmul.f32 %v552_v28, %v1694_v9  ;;  %v555_v31 = vmul.f32 %v552_v28, %v1660_v45  ;;  %v469_v32 = vadd.f32 %v465_v29, %v452_v25  ;;  %v934_v28 = vperm.slane %v220_v58, 5  ;;  %v1818_v58 = vld [vmem:[#allocation2 + $0xa] sm:$0xff] }
 0x179   : > { %v480_v33 = vadd.f32 %v478_v26, %v469_v32  ;;  %558 = vrot.lane.b32.xlu0 %v554_v30, %s2010_s13  ;;  %560 = vrot.lane.b32.xlu1 %v555_v31, %s2010_s13 }
 0x17b   : > { %v1740_v36 = vadd.f32 %v493_v34, %v480_v33 }
 0x17d   : > { %v514_v6 = vadd.f32 %v510_v2, %v1740_v36 }
 0x17e   : > { %v569_v37 = vpop.permute.xlu2 %568  ;;  %v491_v20 = vpop.permute.xlu0 %490 }
 0x17f   : > { %v571_v38 = vmul.f32 %v569_v37, %v1694_v9  ;;  %v572_v19 = vmul.f32 %v569_v37, %v1660_v45  ;;  %v496_v39 = vadd.f32 %v491_v20, %v479_v11 }
 0x181   : > { %575 = vrot.lane.b32.xlu0 %v571_v38, %s2011_s1  ;;  %577 = vrot.lane.b32.xlu1 %v572_v19, %s2011_s1 }
 0x186   : > { %v586_v41 = vpop.permute.xlu2 %585  ;;  %v508_v3 = vpop.permute.xlu0 %507 }
 0x187   : > { %v588_v42 = vmul.f32 %v586_v41, %v1694_v9  ;;  %v589_v43 = vmul.f32 %v586_v41, %v1660_v45  ;;  %v513_v5 = vadd.f32 %v508_v3, %v496_v39 }
 0x189   : > { %592 = vrot.lane.b32.xlu0 %v588_v42, %s2013_s9  ;;  %594 = vrot.lane.b32.xlu1 %v589_v43, %s2013_s9 }
 0x18e   : > { %v603_v13 = vpop.permute.xlu2 %602 }
 0x18f   : > { %v605_v44 = vmul.f32 %v603_v13, %v1694_v9  ;;  %v606_v21 = vmul.f32 %v603_v13, %v1660_v45 }
 0x191   : > { %609 = vrot.lane.b32.xlu0 %v605_v44, %s2014_s7  ;;  %611 = vrot.lane.b32.xlu1 %v606_v21, %s2014_s7 }
 0x196   : > { %v620_v27 = vpop.permute.xlu2 %619 }
 0x197   : > { %v622_v46 = vmul.f32 %v620_v27, %v1694_v9  ;;  %v623_v47 = vmul.f32 %v620_v27, %v1660_v45 }
 0x199   : > { %626 = vrot.lane.b32.xlu0 %v622_v46, %s2015_s8  ;;  %628 = vrot.lane.b32.xlu1 %v623_v47, %s2015_s8 }
 0x19e   : > { %v637_v49 = vpop.permute.xlu2 %636 }
 0x19f   : > { %v639_v50 = vmul.f32 %v637_v49, %v1694_v9  ;;  %v640_v1 = vmul.f32 %v637_v49, %v1660_v45 }
 0x1a1   : > { %643 = vrot.lane.b32.xlu0 %v639_v50, %s2016_s29  ;;  %653 = vrot.lane.b32.xlu1 %v651_v48, %s2017_s30 }
 0x1a6   : > { %v671_v14 = vpop.permute.xlu2 %670 }
 0x1a7   : > { %v673_v15 = vmul.f32 %v671_v14, %v1694_v9  ;;  %v674_v48 = vmul.f32 %v671_v14, %v1660_v45 }
 0x1a9   : > { %687 = vrot.lane.b32.xlu0 %v685_v51, %s2018_s5  ;;  %704 = vrot.lane.b32.xlu1 %v702_v52, %s2019_s12 }
 0x1b1   : > { %766 = vrot.lane.b32.xlu1 %v764_v55, %s1471_s21  ;;  %749 = vrot.lane.b32.xlu0 %v747_v56, %s2021_s26  ;;  %s2026_s21 = smov 9   ;;  %s2032_s26 = smov 1   ;;  %v1815_v56 = vld [vmem:[#allocation2 + $0x2] sm:$0xff] }
 0x1b9   : > { %817 = vrot.lane.b32.xlu1 %v815_v35, %s2022_s0  ;;  %800 = vrot.lane.b32.xlu0 %v798_v57, %s2023_s23  ;;  %s2027_s0 = smov 8   ;;  %s2029_s23 = smov 117   ;;  %v733_v35 = vpop.permute.xlu2 %732 }
 0x1ba   : > { %834 = vrot.lane.b32.xlu2 %v832_v0, %s2027_s0  ;;  %v735_v59 = vmul.f32 %v733_v35, %v1815_v56  ;;  %v736_v53 = vmul.f32 %v733_v35, %v1818_v58 }
 0x1c1   : > { %868 = vrot.lane.b32.xlu1 %v866_v60, %s2025_s19  ;;  %851 = vrot.lane.b32.xlu0 %v849_v61, %s2026_s21  ;;  %s2028_s19 = smov 116   ;;  %s1038_s21 = sshll.u32 %s1599_s11, 4  ;;  %s1039_s21 = int_to_ptr.vmem [resolvable:$true] %s1038_s21 }
 0x1c2   : > { %885 = vrot.lane.b32.xlu2 %v883_v12, %s2009_s22  ;;  %s2030_s22 = smov 115  }
 0x1c9   : > { %919 = vrot.lane.b32.xlu1 %v917_v62, %s2012_s6  ;;  %902 = vrot.lane.b32.xlu0 %v900_v63, %s2017_s30  ;;  %s2033_s30 = smov 127   ;;  %s2035_s6 = smov 125   ;;  %v784_v63 = vpop.permute.xlu2 %783 }
 0x1ca   : > { %936 = vrot.lane.b32.xlu2 %v934_v28, %s2018_s5  ;;  %s2034_s5 = smov 126   ;;  %v787_v3 = vmul.f32 %v784_v63, %v1818_v58 }
 0x1d1   : > { %645 = vrot.lane.b32.xlu1 %v640_v1, %s2016_s29  ;;  %953 = vrot.lane.b32.xlu0 %v951_v4, %s2019_s12  ;;  %s2031_s12 = smov 114   ;;  %v786_v1 = vmul.f32 %v784_v63, %v1815_v56 }
 0x1d9   : > { %677 = vrot.lane.b32.xlu1 %v673_v15, %s2028_s19 }
 0x1db   : > { %v527_v7 = vpop.permute.xlu1 %526  ;;  %v525_v8 = vpop.permute.xlu0 %524 }
 0x1dc   : > { %v531_v10 = vadd.f32 %v527_v7, %v514_v6  ;;  %v530_v11 = vadd.f32 %v525_v8, %v513_v5 }
 0x1e3   : > { %v544_v16 = vpop.permute.xlu1 %543  ;;  %v542_v17 = vpop.permute.xlu0 %541 }
 0x1e4   : > { %v548_v18 = vadd.f32 %v544_v16, %v531_v10  ;;  %v547_v22 = vadd.f32 %v542_v17, %v530_v11 }
 0x1eb   : > { %v561_v23 = vpop.permute.xlu1 %560  ;;  %v559_v24 = vpop.permute.xlu0 %558 }
 0x1ec   : > { %v565_v25 = vadd.f32 %v561_v23, %v548_v18  ;;  %v564_v26 = vadd.f32 %v559_v24, %v547_v22 }
 0x1f3   : > { %v578_v29 = vpop.permute.xlu1 %577  ;;  %v576_v30 = vpop.permute.xlu0 %575 }
 0x1f4   : > { %v582_v31 = vadd.f32 %v578_v29, %v565_v25  ;;  %v581_v32 = vadd.f32 %v576_v30, %v564_v26 }
 0x1fb   : > { %v595_v33 = vpop.permute.xlu1 %594  ;;  %v593_v34 = vpop.permute.xlu0 %592 }
 0x1fc   : > { %v599_v36 = vadd.f32 %v595_v33, %v582_v31  ;;  %v598_v37 = vadd.f32 %v593_v34, %v581_v32 }
 0x203   : > { %v612_v20 = vpop.permute.xlu1 %611  ;;  %v610_v38 = vpop.permute.xlu0 %609 }
 0x204   : > { %v616_v19 = vadd.f32 %v612_v20, %v599_v36  ;;  %v615_v39 = vadd.f32 %v610_v38, %v598_v37  ;;  %v1294_v38 = vld [vmem:[%s1947_s2] ss:$0 sm:$0xff] }
 0x20b   : > { %v629_v40 = vpop.permute.xlu1 %628  ;;  %v627_v41 = vpop.permute.xlu0 %626 }
 0x20c   : > { %v1796_v42 = vadd.f32 %v629_v40, %v616_v19  ;;  %v632_v43 = vadd.f32 %v627_v41, %v615_v39 }
 0x213   : > { %v654_v13 = vpop.permute.xlu1 %653  ;;  %v644_v44 = vpop.permute.xlu0 %643 }
 0x214   : > { %v656_v21 = vmul.f32 %v654_v13, %v1694_v9  ;;  %v657_v27 = vmul.f32 %v654_v13, %v1660_v45  ;;  %v1800_v46 = vadd.f32 %v644_v44, %v632_v43  ;;  %v835_v8 = vpop.permute.xlu2 %834 }
 0x215   : > { %v837_v11 = vmul.f32 %v835_v8, %v1815_v56  ;;  %v838_v14 = vmul.f32 %v835_v8, %v1818_v58 }
 0x216   : > { %662 = vrot.lane.b32.xlu0 %v657_v27, %s2029_s23  ;;  %660 = vrot.lane.b32.xlu2 %v656_v21, %s2029_s23 }
 0x21b   : > { %v688_v47 = vpop.permute.xlu0 %687  ;;  %v705_v51 = vpop.permute.xlu1 %704 }
 0x21c   : > { %v690_v49 = vmul.f32 %v688_v47, %v1694_v9  ;;  %v691_v50 = vmul.f32 %v688_v47, %v1660_v45  ;;  %v707_v52 = vmul.f32 %v705_v51, %v1694_v9  ;;  %v708_v55 = vmul.f32 %v705_v51, %v1660_v45  ;;  %v886_v22 = vpop.permute.xlu2 %885 }
 0x21d   : > { %v888_v24 = vmul.f32 %v886_v22, %v1815_v56  ;;  %v889_v26 = vmul.f32 %v886_v22, %v1818_v58 }
 0x21e   : > { %679 = vrot.lane.b32.xlu2 %v674_v48, %s2028_s19  ;;  %696 = vrot.lane.b32.xlu1 %v691_v50, %s2030_s22 }
 0x21f   : > { %694 = vrot.lane.b32.xlu0 %v690_v49, %s2030_s22 }
 0x223   : > { %v750_v57 = vpop.permute.xlu0 %749  ;;  %v767_v45 = vpop.permute.xlu1 %766 }
 0x224   : > { %v752_v9 = vmul.f32 %v750_v57, %v1815_v56  ;;  %v770_v60 = vmul.f32 %v767_v45, %v1818_v58  ;;  %v769_v61 = vmul.f32 %v767_v45, %v1815_v56  ;;  %v753_v62 = vmul.f32 %v750_v57, %v1818_v58  ;;  %v937_v32 = vpop.permute.xlu2 %936 }
 0x225   : > { %v939_v34 = vmul.f32 %v937_v32, %v1815_v56  ;;  %v940_v37 = vmul.f32 %v937_v32, %v1818_v58 }
 0x226   : > { %711 = vrot.lane.b32.xlu2 %v707_v52, %s2031_s12  ;;  %723 = vrot.lane.b32.xlu1 %v721_v54, %s2032_s26 }
 0x227   : > { %713 = vrot.lane.b32.xlu0 %v708_v55, %s2031_s12 }
 0x22b   : > { %v801_v0 = vpop.permute.xlu0 %800  ;;  %v818_v4 = vpop.permute.xlu1 %817 }
 0x22c   : > { %v803_v2 = vmul.f32 %v801_v0, %v1815_v56  ;;  %v821_v5 = vmul.f32 %v818_v4, %v1818_v58  ;;  %v820_v6 = vmul.f32 %v818_v4, %v1815_v56  ;;  %v804_v7 = vmul.f32 %v801_v0, %v1818_v58 }
 0x22e   : > { %739 = vrot.lane.b32.xlu2 %v735_v59, %s2033_s30  ;;  %756 = vrot.lane.b32.xlu1 %v752_v9, %s2034_s5 }
 0x22f   : > { %741 = vrot.lane.b32.xlu0 %v736_v53, %s2033_s30 }
 0x233   : > { %v852_v10 = vpop.permute.xlu0 %851  ;;  %v869_v15 = vpop.permute.xlu1 %868 }
 0x234   : > { %v854_v12 = vmul.f32 %v852_v10, %v1815_v56  ;;  %v872_v16 = vmul.f32 %v869_v15, %v1818_v58  ;;  %v871_v17 = vmul.f32 %v869_v15, %v1815_v56  ;;  %v855_v18 = vmul.f32 %v852_v10, %v1818_v58 }
 0x236   : > { %758 = vrot.lane.b32.xlu2 %v753_v62, %s2034_s5  ;;  %775 = vrot.lane.b32.xlu1 %v770_v60, %s2035_s6  ;;  %s1369_s5 = scalar_lea.hbm %s1948_s3, 32 }
 0x237   : > { %773 = vrot.lane.b32.xlu0 %v769_v61, %s2035_s6 }
 0x23b   : > { %v903_v23 = vpop.permute.xlu0 %902  ;;  %v920_v28 = vpop.permute.xlu1 %919 }
 0x23c   : > { %v905_v25 = vmul.f32 %v903_v23, %v1815_v56  ;;  %v923_v29 = vmul.f32 %v920_v28, %v1818_v58  ;;  %v922_v30 = vmul.f32 %v920_v28, %v1815_v56  ;;  %v906_v31 = vmul.f32 %v903_v23, %v1818_v58 }
 0x23e   : > { %790 = vrot.lane.b32.xlu2 %v786_v1, %s2036_s24  ;;  %807 = vrot.lane.b32.xlu1 %v803_v2, %s2010_s13 }
 0x23f   : > { %792 = vrot.lane.b32.xlu0 %v787_v3, %s2036_s24 }
 0x243   : > { %v954_v33 = vpop.permute.xlu0 %953  ;;  %v646_v40 = vpop.permute.xlu1 %645 }
 0x244   : > { %v956_v36 = vmul.f32 %v954_v33, %v1815_v56  ;;  %v957_v19 = vmul.f32 %v954_v33, %v1818_v58  ;;  %v650_v9 = vadd.f32 %v646_v40, %v1796_v42 }
 0x246   : > { %809 = vrot.lane.b32.xlu2 %v804_v7, %s2010_s13  ;;  %826 = vrot.lane.b32.xlu1 %v821_v5, %s2011_s1 }
 0x247   : > { %824 = vrot.lane.b32.xlu0 %v820_v6, %s2011_s1 }
 0x24b   : > { %v678_v43 = vpop.permute.xlu1 %677 }
 0x24e   : > { %841 = vrot.lane.b32.xlu2 %v837_v11, %s2013_s9  ;;  %858 = vrot.lane.b32.xlu1 %v854_v12, %s2014_s7 }
 0x24f   : > { %843 = vrot.lane.b32.xlu0 %v838_v14, %s2013_s9 }
 0x256   : > { %860 = vrot.lane.b32.xlu2 %v855_v18, %s2014_s7  ;;  %877 = vrot.lane.b32.xlu1 %v872_v16, %s2015_s8 }
 0x257   : > { %875 = vrot.lane.b32.xlu0 %v871_v17, %s2015_s8 }
 0x25e   : > { %892 = vrot.lane.b32.xlu2 %v888_v24, %s2016_s29  ;;  %909 = vrot.lane.b32.xlu1 %v905_v25, %s2029_s23 }
 0x25f   : > { %894 = vrot.lane.b32.xlu0 %v889_v26, %s2016_s29  ;;  %s1189_s29 = sshll.u32 %s1457_s18, 4 }
 0x260   : > { %s1037_s9 = scalar_lea.hbm %s1948_s3, %s1189_s29 }
 0x266   : > { %911 = vrot.lane.b32.xlu2 %v906_v31, %s2029_s23  ;;  %928 = vrot.lane.b32.xlu1 %v923_v29, %s2028_s19  ;;  %s1019_s23 = scalar_lea.sflag [#allocation6], %s1585_s10 }
 0x267   : > { %926 = vrot.lane.b32.xlu0 %v922_v30, %s2028_s19  ;;  %s1040_s19 = sshll.u32 %s1037_s9, 4  ;;  %s1041_s19 = int_to_ptr.hbm [resolvable:$true] %s1040_s19 }
 0x26e   : > { %943 = vrot.lane.b32.xlu2 %v939_v34, %s2030_s22  ;;  %960 = vrot.lane.b32.xlu1 %v956_v36, %s2031_s12 }
 0x26f   : > { %945 = vrot.lane.b32.xlu0 %v940_v37, %s2030_s22  ;;  %s1363_s22 = sshra.s32 %s1041_s19, 4  ;;  %s1364_s22 = int_to_ptr.hbm [resolvable:$true] %s1363_s22 }
 0x270   : > { %v661_v20 = vpop.permute.xlu2 %660  ;;  %p1370_p10 = scmp.lt.s32.totalorder %s1364_s22, %s1948_s3 }
 0x271   : > { %v666_v45 = vadd.f32 %v661_v20, %v1800_v46 }
 0x273   : > { %v683_v63 = vadd.f32 %v678_v43, %v666_v45 }
 0x276   : > { %962 = vrot.lane.b32.xlu2 %v957_v19, %s2031_s12  ;;  %s1365_s12 = scalar_lea.hbm %s1364_s22, 16 }
 0x277   : > { %971 = vrot.lane.b32.xlu0 %v1294_v38, %s2032_s26  ;;  %p1366_p6 = scmp.ne.s32.totalorder %s1364_s22, %s1365_s12  ;;  %p1371_p11 = scmp.lt.s32.totalorder %s1369_s5, %s1365_s12 }
 0x278   : > { %v680_v39 = vpop.permute.xlu2 %679 }
 0x279   : > { %p1367_p7 = pnand %p1366_p6, %p1566_p4  ;;  %p1372_p12 = por %p1371_p11, %p1370_p10 }
 0x27b   : > { %p1368_p9 = pneg %p1367_p7 }
 0x27d   : > { %p1373_p13 = pnand %p1372_p12, %p1368_p9 }
 0x280   : > { %v712_v41 = vpop.permute.xlu2 %711 }
 0x288   : > { %v663_v13 = vpop.permute.xlu0 %662  ;;  %v740_v44 = vpop.permute.xlu2 %739 }
 0x289   : > { %v667_v60 = vadd.f32 %v663_v13, %v650_v9 }
 0x28b   : > { %v684_v0 = vadd.f32 %v680_v39, %v667_v60 }
 0x290   : > { %v697_v21 = vpop.permute.xlu1 %696  ;;  %v759_v47 = vpop.permute.xlu2 %758 }
 0x291   : > { %v695_v27 = vpop.permute.xlu0 %694  ;;  %v701_v1 = vadd.f32 %v697_v21, %v684_v0 }
 0x292   : > { %v700_v2 = vadd.f32 %v695_v27, %v683_v63 }
 0x294   : > { %v717_v7 = vadd.f32 %v712_v41, %v700_v2 }
 0x298   : > { %v724_v48 = vpop.permute.xlu1 %723  ;;  %v791_v51 = vpop.permute.xlu2 %790 }
 0x299   : > { %v714_v49 = vpop.permute.xlu0 %713  ;;  %v726_v3 = vmul.f32 %v724_v48, %v1815_v56  ;;  %v727_v4 = vmul.f32 %v724_v48, %v1818_v58 }
 0x29a   : > { %v718_v5 = vadd.f32 %v714_v49, %v701_v1 }
 0x29b   : > { %v728_v42 = vadd.f32 %v726_v3, %v717_v7 }
 0x29c   : > { %v729_v11 = vadd.f32 %v727_v4, %v718_v5 }
 0x29d   : > { %v745_v46 = vadd.f32 %v740_v44, %v728_v42 }
 0x2a0   : > { %v757_v50 = vpop.permute.xlu1 %756  ;;  %v810_v35 = vpop.permute.xlu2 %809 }
 0x2a1   : > { %v742_v52 = vpop.permute.xlu0 %741  ;;  %v762_v14 = vadd.f32 %v757_v50, %v745_v46 }
 0x2a2   : > { %v746_v12 = vadd.f32 %v742_v52, %v729_v11 }
 0x2a4   : > { %v763_v15 = vadd.f32 %v759_v47, %v746_v12 }
 0x2a8   : > { %v776_v54 = vpop.permute.xlu1 %775  ;;  %v842_v53 = vpop.permute.xlu2 %841 }
 0x2a9   : > { %v774_v55 = vpop.permute.xlu0 %773  ;;  %v780_v22 = vadd.f32 %v776_v54, %v763_v15 }
 0x2aa   : > { %v779_v23 = vadd.f32 %v774_v55, %v762_v14 }
 0x2ac   : > { %v796_v56 = vadd.f32 %v791_v51, %v779_v23 }
 0x2b0   : > { %v808_v57 = vpop.permute.xlu1 %807  ;;  %v861_v6 = vpop.permute.xlu2 %860 }
 0x2b1   : > { %v793_v59 = vpop.permute.xlu0 %792  ;;  %v813_v25 = vadd.f32 %v808_v57, %v796_v56 }
 0x2b2   : > { %v797_v24 = vadd.f32 %v793_v59, %v780_v22 }
 0x2b4   : > { %v814_v58 = vadd.f32 %v810_v35, %v797_v24 }
 0x2b8   : > { %v827_v61 = vpop.permute.xlu1 %826  ;;  %v893_v17 = vpop.permute.xlu2 %892 }
 0x2b9   : > { %v825_v62 = vpop.permute.xlu0 %824  ;;  %v831_v29 = vadd.f32 %v827_v61, %v814_v58 }
 0x2ba   : > { %v830_v30 = vadd.f32 %v825_v62, %v813_v25 }
 0x2bc   : > { %v847_v33 = vadd.f32 %v842_v53, %v830_v30 }
 0x2c0   : > { %v859_v8 = vpop.permute.xlu1 %858  ;;  %v912_v31 = vpop.permute.xlu2 %911 }
 0x2c1   : > { %v844_v10 = vpop.permute.xlu0 %843  ;;  %v864_v34 = vadd.f32 %v859_v8, %v847_v33 }
 0x2c2   : > { %v848_v32 = vadd.f32 %v844_v10, %v831_v29 }
 0x2c4   : > { %v865_v36 = vadd.f32 %v861_v6, %v848_v32 }
 0x2c8   : > { %v878_v16 = vpop.permute.xlu1 %877  ;;  %v944_v40 = vpop.permute.xlu2 %943 }
 0x2c9   : > { %v876_v18 = vpop.permute.xlu0 %875  ;;  %v882_v20 = vadd.f32 %v878_v16, %v865_v36 }
 0x2ca   : > { %v881_v38 = vadd.f32 %v876_v18, %v864_v34 }
 0x2cc   : > { %v898_v41 = vadd.f32 %v893_v17, %v881_v38 }
 0x2d0   : > { %v910_v26 = vpop.permute.xlu1 %909  ;;  %v963_v50 = vpop.permute.xlu2 %962 }
 0x2d1   : > { %v895_v28 = vpop.permute.xlu0 %894  ;;  %v915_v43 = vadd.f32 %v910_v26, %v898_v41 }
 0x2d2   : > { %v899_v39 = vadd.f32 %v895_v28, %v882_v20 }
 0x2d4   : > { %v916_v13 = vadd.f32 %v912_v31, %v899_v39 }
 0x2d8   : > { %v929_v19 = vpop.permute.xlu1 %928 }
 0x2d9   : > { %v927_v37 = vpop.permute.xlu0 %926  ;;  %v933_v21 = vadd.f32 %v929_v19, %v916_v13 }
 0x2da   : > { %v932_v27 = vadd.f32 %v927_v37, %v915_v43 }
 0x2dc   : > { %v949_v49 = vadd.f32 %v944_v40, %v932_v27 }
 0x2e0   : > { %v961_v48 = vpop.permute.xlu1 %960 }
 0x2e1   : > { %v946_v44 = vpop.permute.xlu0 %945  ;;  %v966_v51 = vadd.f32 %v961_v48, %v949_v49 }
 0x2e2   : > { %v950_v47 = vadd.f32 %v946_v44, %v933_v21 }
 0x2e4   : > { %v967_v52 = vadd.f32 %v963_v50, %v950_v47 }
 0x2e9   : > { %v972_v54 = vpop.permute.xlu0 %971 }
 0x2ea   : > { %v974_v55 = vadd.f32 %v972_v54, %v966_v51  ;;  %v975_v35 = vadd.f32 %v972_v54, %v967_v52 }
 0x2ec   : > { %v976_v57 = vmax.f32 %v974_v55, 0.0  ;;  %v977_v59 = vmax.f32 %v975_v35, 0.0 }
 0x2ee   : > { %v990_v9 = vsel %vm989_vm0, %v976_v57, 0.0  ;;  %v991_v53 = vsel %vm989_vm0, %v977_v59, 0.0  ;;  %v999_v45 = vmul.f32 %v976_v57, %v976_v57  ;;  %v1000_v60 = vmul.f32 %v977_v59, %v977_v59  ;;  %982 = vrot.lane.b32.xlu2 %v977_v59, %s2033_s30  ;;  %980 = vrot.lane.b32.xlu1 %v976_v57, %s2033_s30 }
 0x2ef   : > { %v992_v61 = vadd.f32 %v991_v53, %v990_v9 }
 0x2f0   : > { %v1001_v62 = vsel %vm989_vm0, %v999_v45, 0.0  ;;  %v1002_v63 = vsel %vm989_vm0, %v1000_v60, 0.0 }
 0x2f1   : > { %v993_v0 = vrot.slane %v992_v61, 4  ;;  %v1003_v1 = vadd.f32 %v1002_v63, %v1001_v62 }
 0x2f3   : > { %v994_v2 = vadd.f32 %v993_v0, %v992_v61  ;;  %v1004_v3 = vrot.slane %v1003_v1, 4 }
 0x2f5   : > { %v995_v4 = vrot.slane %v994_v2, 2  ;;  %v1005_v5 = vadd.f32 %v1004_v3, %v1003_v1 }
 0x2f7   : > { %v996_v6 = vadd.f32 %v995_v4, %v994_v2  ;;  %v1006_v7 = vrot.slane %v1005_v5, 2 }
 0x2f9   : > { %v997_v8 = vrot.slane %v996_v6, 1  ;;  %v1007_v10 = vadd.f32 %v1006_v7, %v1005_v5 }
 0x2fb   : > { %v1008_v42 = vrot.slane %v1007_v10, 1  ;;  %v998_v11 = vadd.f32 %v997_v8, %v996_v6 }
 0x2fd   : > { %v1009_v12 = vadd.f32 %v1008_v42, %v1007_v10 }
 0x2ff   : > { %v1011_v46 = vsel %vm1010_vm1, %v998_v11, %v1009_v12 }
 0x300   : > { %1013 = vrot.lane.b32.xlu0 %v1011_v46, %s2033_s30 }
 0x348   : > { %v983_v14 = vpop.permute.xlu2 %982 }
 0x349   : > { %988 = vst.msk [vmem:[%s1599_s11 + $0x8] sm:$0xff] %vm986_vm2, %v983_v14 }
 0x360   : > { %v981_v15 = vpop.permute.xlu1 %980 }
 0x361   : > { %987 = vst.msk [vmem:[%s1599_s11] sm:$0xff] %vm986_vm2, %v981_v15 }
 0x362   : > { %1376 = shalt.err (!%p1373_p13)
}
 0x363   : > { %s1500_s11 = smov 128   ;;  %s1185_s1 = sshll.u32 %s1457_s18, 1  ;;  %vm1016_vm3 = vcmask 517120  }
 0x364   : > { %1194 = dma.vmem_to_hbm [thread:$0]  (%p1566_p4), %s1039_s21, 256, %s1041_s19, %s1019_s23, %s1500_s11, %s1500_s11, %s2027_s0  }
 0x365   : > { %s1054_s7 = scalar_lea.hbm %s1949_s4, %s1185_s1  ;;  %s1056_s8 = sshll.u32 %s1601_s14, 4  ;;  %s1057_s8 = int_to_ptr.vmem [resolvable:$true] %s1056_s8 }
 0x366   : > { %s1058_s9 = sshll.u32 %s1054_s7, 4  ;;  %s1024_s22 = scalar_lea.sflag [#allocation9], %s1585_s10  ;;  %s1059_s9 = int_to_ptr.hbm [resolvable:$true] %s1058_s9 }
 0x367   : > { %s1391_s12 = sshra.s32 %s1059_s9, 4  ;;  %s1397_s21 = scalar_lea.hbm %s1949_s4, 4  ;;  %s1392_s12 = int_to_ptr.hbm [resolvable:$true] %s1391_s12 }
 0x368   : > { %s1393_s26 = scalar_lea.hbm %s1392_s12, 2  ;;  %p1398_p3 = scmp.lt.s32.totalorder %s1392_s12, %s1949_s4 }
 0x369   : > { %p1394_p0 = scmp.ne.s32.totalorder %s1392_s12, %s1393_s26  ;;  %p1399_p5 = scmp.lt.s32.totalorder %s1397_s21, %s1393_s26 }
 0x36b   : > { %p1395_p1 = pnand %p1394_p0, %p1566_p4  ;;  %p1400_p6 = por %p1399_p5, %p1398_p3 }
 0x36d   : > { %p1396_p2 = pneg %p1395_p1 }
 0x36f   : > { %p1401_p7 = pnand %p1400_p6, %p1396_p2 }
 0x372   : > { %v1014_v16 = vpop.permute.xlu0 %1013 }
 0x373   : > { %1017 = vst.msk [vmem:[%s1601_s14] sm:$0x3] %vm1016_vm3, %v1014_v16 }
 0x374   : > { %1404 = shalt.err (!%p1401_p7)
}
 0x375   : > { %1195 = dma.vmem_to_hbm [thread:$0]  (%p1566_p4), %s1057_s8, 32, %s1059_s9, %s1024_s22  }
 0x376 PF: > { %p1211_p9 = scmp.ge.s32.totalorder %s1465_s20, 2  ;;  %s1070_s10 = sand.u32 1, %s1445_s15  }
 0x377   : > { %s1071_s14 = scalar_lea.sflag [#allocation6], %s1070_s10 }
 0x378   : > { %p1203_p10 = pnand %p1211_p9, %p1573_p8 }
 0x37a   : > { %p1204_p11 = pneg %p1203_p10 }
 0x37c   : > { %1436 = dma.done.wait (%p1204_p11), %s1071_s14, 256  }
 0x37d   : > { %1438 = vsyncadd (%p1204_p11), %s1071_s14, 4294967040  ;;  %s1081_s30 = scalar_lea.sflag [#allocation9], %s1070_s10 }
 0x37e   : > { %1440 = dma.done.wait (%p1204_p11), %s1081_s30, 32  }
 0x37f   : > { %1442 = vsyncadd (%p1204_p11), %s1081_s30, 4294967264  ;;  %s22_s20 = sadd.s32 1, %s1465_s20   ;;  %s2037_s18 = sld [smem:[#allocation18_spill]] }
 0x380   : > { %p19_p12 = scmp.ge.s32.totalorder %s22_s20, 4   ;;  %s2038_s19 = sld [smem:[#allocation19_spill]] }
 0x381   : > { %s2039_s15 = smov %s1449_s16  ;;  %s2040_s16 = smov %s1453_s17 }
 0x382   : > { %s2041_s17 = smov %s1579_s28  ;;  %21 = sbr.rel (!%p19_p12) target bundleno = 10 (0xa), region = 87 }
 0x387   :  { %1087 = vsyncpa [#allocation5], 1 }
 0x388   :  { %1089 = vsyncpa [#allocation5 + $0x1], 1 }
 0x389   :  { %1090 = vsyncpa [#allocation6], 1 }
 0x38a   :  { %1092 = vsyncpa [#allocation6 + $0x1], 1 }
 0x38b   :  { %1093 = vsyncpa [#allocation9], 1 }
 0x38c   :  { %1095 = vsyncpa [#allocation9 + $0x1], 1 }
 0x38d   :  { %1096 = vsyncmov [#allocation3] }
 0x390   :  { %s1097_s25 = vpop.sfrf %1096 }
 0x391   :  { %p1188_p4 = scmp.ne.s32.totalorder %s1097_s25, 0 }
 0x393   :  { %1101 = shalt.err (%p1188_p4)  }

</bundles_post_ra>
